<compile_context>
chip_gen: v7x
topology: tpu7x:2x2x1
jax: 0.10.0
libtpu: 0.0.40
codegen_flags: <defaults>
</compile_context>

<pallas_src>
import functools

import jax
import jax.numpy as jnp
from jax import lax
from jax.experimental import pallas as pl
from jax.experimental.pallas import tpu as pltpu

EPS = 1e-5
LANES = 128


def _round_up(x, m):
    return ((x + m - 1) // m) * m


# ------------------------------ Pallas kernels ------------------------------

def conv_block_kernel(p_ref, w_ref, g_ref, b_ref, o_ref):
    """Fused Conv2d(as matmul) -> BatchNorm2d(train stats) -> ReLU in one call.

    p_ref : [M, CKKP]     f32 im2col patches (contraction dim zero-padded)
    w_ref : [CKKP, COUTP] bf16 weight (rows ordered (ki, kj, ci), lanes padded)
    g_ref : [1, COUTP]    f32 BN gamma (padded lanes are 0)
    b_ref : [1, COUTP]    f32 BN beta  (padded lanes are 0)
    o_ref : [M, COUTP]    f32 lane-dense output
    """
    inv_m = 1.0 / p_ref.shape[0]
    # bf16 cast in-kernel (hidden under the MXU); f32 accumulation.
    y = jnp.dot(p_ref[...].astype(jnp.bfloat16), w_ref[...],
                preferred_element_type=jnp.float32)
    mu = jnp.sum(y, axis=0, keepdims=True) * inv_m
    d = y - mu
    var = jnp.sum(d * d, axis=0, keepdims=True) * inv_m        # two-pass variance
    scale = g_ref[...] * lax.rsqrt(var + EPS)
    o_ref[...] = jnp.maximum(d * scale + b_ref[...], 0.0)      # padded lanes stay 0


def classifier_kernel(x_ref, mask_ref, w1_ref, g1_ref, b1_ref,
                      w2_ref, g2_ref, b2_ref, w3_ref, b3_ref, out_ref, *, inv_n):
    """Linear+BN1d+ReLU -> Linear+BN1d+ReLU -> Linear(+bias); bf16 MXU, f32 BN.

    Batch is padded to 8 sublanes; mask_ref ([NP,1], 1.0 on real rows) keeps the
    BN batch statistics restricted to the real rows.
    """
    mask = mask_ref[...]

    def bn_relu(h, g, b):
        mu = jnp.sum(h * mask, axis=0, keepdims=True) * inv_n
        d = (h - mu) * mask
        var = jnp.sum(d * d, axis=0, keepdims=True) * inv_n
        return jnp.maximum((h - mu) * (g * lax.rsqrt(var + EPS)) + b, 0.0)

    h = jnp.dot(x_ref[...].astype(jnp.bfloat16), w1_ref[...],
                preferred_element_type=jnp.float32)
    h = bn_relu(h, g1_ref[...], b1_ref[...])
    h = jnp.dot(h.astype(jnp.bfloat16), w2_ref[...],
                preferred_element_type=jnp.float32)
    h = bn_relu(h, g2_ref[...], b2_ref[...])
    out_ref[...] = jnp.dot(h.astype(jnp.bfloat16), w3_ref[...],
                           preferred_element_type=jnp.float32) + b3_ref[...]


# ------------------- conv_block: Conv2d -> BN2d(train) -> ReLU -------------------

def conv_block_nhwc(x, weight, gamma, beta, *, kernel_size=5):
    """x: [N,H,W,Cin] f32.  weight: torch layout [Cout,Cin,K,K] (no bias)."""
    N, H, W, Cin = x.shape
    Cout = weight.shape[0]
    K = kernel_size
    OH, OW = H - K + 1, W - K + 1
    M = N * OH * OW
    CKK = K * K * Cin
    CKKP = _round_up(CKK, LANES)
    COUTP = _round_up(Cout, LANES)

    # im2col; the pad-to-128 of the contraction dim is folded into the same
    # concat (one extra zero slab), so the patch buffer is built exactly once.
    slabs = [x[:, i:i + OH, j:j + OW, :] for i in range(K) for j in range(K)]
    if CKKP > CKK:
        slabs.append(jnp.zeros((N, OH, OW, CKKP - CKK), x.dtype))
    patches = jnp.concatenate(slabs, axis=-1).reshape(M, CKKP)   # f32, cast in-kernel

    # Weight/BN params are tiny; prep them on the wrapper side.
    w2d = weight.transpose(2, 3, 1, 0).reshape(CKK, Cout)        # rows (ki,kj,ci)
    w2d = jnp.pad(w2d, ((0, CKKP - CKK), (0, COUTP - Cout))).astype(jnp.bfloat16)
    g = jnp.pad(gamma, (0, COUTP - Cout)).reshape(1, COUTP)
    b = jnp.pad(beta, (0, COUTP - Cout)).reshape(1, COUTP)

    out_flat = pl.pallas_call(
        conv_block_kernel,
        out_shape=jax.ShapeDtypeStruct((M, COUTP), jnp.float32),
        in_specs=[pl.BlockSpec(memory_space=pltpu.MemorySpace.VMEM)] * 4,
        out_specs=pl.BlockSpec(memory_space=pltpu.MemorySpace.VMEM),
    )(patches, w2d, g, b)

    return out_flat.reshape(N, OH, OW, COUTP)[..., :Cout]


def adaptive_max_pool_nhwc(x, out_size):
    # PyTorch AdaptiveMaxPool2d for the exactly-divisible case (true here: 12->12, 8->4).
    N, H, W, C = x.shape
    if H == out_size and W == out_size:
        return x
    assert H % out_size == 0 and W % out_size == 0
    kh, kw = H // out_size, W // out_size
    return x.reshape(N, out_size, kh, out_size, kw, C).max(axis=(2, 4))


def classifier_forward(feat, w1, g1, b1, w2, g2, b2, w3, b3):
    # feat: [N, 256] f32; w*: torch layout [out, in]; only the last Linear has bias.
    N = feat.shape[0]
    NP = max(_round_up(N, 8), 8)                  # unmasked sublane loads/stores
    nout = w3.shape[0]
    OUTP = _round_up(nout, LANES)                 # pad 10 -> 128, lane-dense store

    feat_p = jnp.pad(feat, ((0, NP - N), (0, 0)))
    mask = (jnp.arange(NP) < N).astype(jnp.float32).reshape(NP, 1)
    w1t = w1.T.astype(jnp.bfloat16)
    w2t = w2.T.astype(jnp.bfloat16)
    w3t = jnp.pad(w3.T, ((0, 0), (0, OUTP - nout))).astype(jnp.bfloat16)
    b3p = jnp.pad(b3, (0, OUTP - nout)).reshape(1, OUTP)

    logits_p = pl.pallas_call(
        functools.partial(classifier_kernel, inv_n=1.0 / N),
        out_shape=jax.ShapeDtypeStruct((NP, OUTP), jnp.float32),
        in_specs=[pl.BlockSpec(memory_space=pltpu.MemorySpace.VMEM)] * 10,
        out_specs=pl.BlockSpec(memory_space=pltpu.MemorySpace.VMEM),
    )(feat_p, mask, w1t, g1.reshape(1, -1), b1.reshape(1, -1),
      w2t, g2.reshape(1, -1), b2.reshape(1, -1), w3t, b3p)
    return logits_p[:N, :nout]


def cnn_forward(x_nchw, p):
    x = x_nchw.transpose(0, 2, 3, 1)                          # NCHW -> NHWC (boundary)
    x = conv_block_nhwc(x, p["conv1_w"], p["bn1_g"], p["bn1_b"])
    x = adaptive_max_pool_nhwc(x, 12)
    x = conv_block_nhwc(x, p["conv2_w"], p["bn2_g"], p["bn2_b"])
    x = adaptive_max_pool_nhwc(x, 4)
    feat = x.transpose(0, 3, 1, 2).reshape(x.shape[0], -1)    # PyTorch Flatten order (C,H,W)
    return classifier_forward(feat, p["fc1_w"], p["bn3_g"], p["bn3_b"],
                              p["fc2_w"], p["bn4_g"], p["bn4_b"],
                              p["fc3_w"], p["fc3_b"])


# ------------------------------ pure-JAX reference ------------------------------
# Mirrors the module in f32, with the same precision policy as the kernels
# (matmul/conv operands cast to bf16, f32 accumulation, f32 BN statistics).

def reference_forward(x, p):
    bf = jnp.bfloat16

    def conv_bn_relu(x, w, g, b):
        y = lax.conv_general_dilated(
            x.astype(bf), w.astype(bf), (1, 1), "VALID",
            dimension_numbers=("NCHW", "OIHW", "NCHW"),
            preferred_element_type=jnp.float32)
        mu = jnp.mean(y, axis=(0, 2, 3), keepdims=True)
        var = jnp.mean((y - mu) ** 2, axis=(0, 2, 3), keepdims=True)
        y = (y - mu) * lax.rsqrt(var + EPS) * g.reshape(1, -1, 1, 1) + b.reshape(1, -1, 1, 1)
        return jnp.maximum(y, 0.0)

    def pool_nchw(x, out_size):
        N, C, H, W = x.shape
        if H == out_size and W == out_size:
            return x
        kh, kw = H // out_size, W // out_size
        return x.reshape(N, C, out_size, kh, out_size, kw).max(axis=(3, 5))

    def linear(h, w):
        return jnp.dot(h.astype(bf), w.T.astype(bf), preferred_element_type=jnp.float32)

    def bn1d_relu(h, g, b):
        mu = jnp.mean(h, axis=0, keepdims=True)
        var = jnp.mean((h - mu) ** 2, axis=0, keepdims=True)
        return jnp.maximum((h - mu) * lax.rsqrt(var + EPS) * g + b, 0.0)

    y = conv_bn_relu(x, p["conv1_w"], p["bn1_g"], p["bn1_b"])
    y = pool_nchw(y, 12)
    y = conv_bn_relu(y, p["conv2_w"], p["bn2_g"], p["bn2_b"])
    y = pool_nchw(y, 4)
    feat = y.reshape(y.shape[0], -1)
    h = bn1d_relu(linear(feat, p["fc1_w"]), p["bn3_g"], p["bn3_b"])
    h = bn1d_relu(linear(h, p["fc2_w"]), p["bn4_g"], p["bn4_b"])
    return linear(h, p["fc3_w"]) + p["fc3_b"].reshape(1, -1)


if __name__ == "__main__":
    N, CIN, H, W = 2, 4, 16, 16

    key = jax.random.PRNGKey(0)
    ks = jax.random.split(key, 15)
    f32 = jnp.float32
    params = {
        "conv1_w": 0.2 * jax.random.normal(ks[0], (6, CIN, 5, 5), f32),
        "bn1_g": 1.0 + 0.1 * jax.random.normal(ks[1], (6,), f32),
        "bn1_b": 0.1 * jax.random.normal(ks[2], (6,), f32),
        "conv2_w": 0.1 * jax.random.normal(ks[3], (16, 6, 5, 5), f32),
        "bn2_g": 1.0 + 0.1 * jax.random.normal(ks[4], (16,), f32),
        "bn2_b": 0.1 * jax.random.normal(ks[5], (16,), f32),
        "fc1_w": 0.05 * jax.random.normal(ks[6], (256, 256), f32),
        "bn3_g": 1.0 + 0.1 * jax.random.normal(ks[7], (256,), f32),
        "bn3_b": 0.1 * jax.random.normal(ks[8], (256,), f32),
        "fc2_w": 0.05 * jax.random.normal(ks[9], (128, 256), f32),
        "bn4_g": 1.0 + 0.1 * jax.random.normal(ks[10], (128,), f32),
        "bn4_b": 0.1 * jax.random.normal(ks[11], (128,), f32),
        "fc3_w": 0.1 * jax.random.normal(ks[12], (10, 128), f32),
        "fc3_b": 0.1 * jax.random.normal(ks[13], (10,), f32),
    }
    x = jax.random.normal(ks[14], (N, CIN, H, W), f32)

    out = jax.jit(cnn_forward)(x, params)
    out = jax.block_until_ready(out)

    ref = reference_forward(x, params)
    assert out.shape == (N, 10), out.shape
    max_err = float(jnp.max(jnp.abs(out - ref)))
    assert jnp.allclose(out, ref, atol=5e-2, rtol=5e-2), max_err

    print("KERNEL_OK")
</pallas_src>

<mosaic_0001>
module attributes {stable_mosaic.version = 11 : i64} {
  func.func @conv_block_kernel(%arg0: memref<288x128xf32, #tpu.memory_space<vmem>>, %arg1: memref<128x128xbf16, #tpu.memory_space<vmem>>, %arg2: memref<1x128xf32, #tpu.memory_space<vmem>>, %arg3: memref<1x128xf32, #tpu.memory_space<vmem>>, %arg4: memref<288x128xf32, #tpu.memory_space<vmem>>) attributes {dimension_semantics = [], scalar_prefetch = 0 : i64, scratch_operands = 0 : i64, tpu.core_type = #tpu.core_type<tc>} {
    %c0 = arith.constant 0 : index
    %c0_0 = arith.constant 0 : index
    %0 = vector.load %arg0[%c0, %c0_0] : memref<288x128xf32, #tpu.memory_space<vmem>>, vector<288x128xf32>
    %1 = arith.truncf %0 : vector<288x128xf32> to vector<288x128xbf16>
    %c0_1 = arith.constant 0 : index
    %c0_2 = arith.constant 0 : index
    %2 = vector.load %arg1[%c0_1, %c0_2] : memref<128x128xbf16, #tpu.memory_space<vmem>>, vector<128x128xbf16>
    %cst = arith.constant dense<0.000000e+00> : vector<288x128xf32>
    %3 = tpu.matmul %1, %2, %cst {dimension_numbers = #tpu.dot_dimension_numbers<[1], [0], [0], [1], [0, 0, 1, 1], [], []>} : vector<288x128xbf16>, vector<128x128xbf16>, vector<288x128xf32> -> vector<288x128xf32>
    %cst_3 = arith.constant dense<0.000000e+00> : vector<128xf32>
    %4 = vector.multi_reduction <add>, %3, %cst_3 [0] : vector<288x128xf32> to vector<128xf32>
    %5 = vector.shape_cast %4 : vector<128xf32> to vector<1x128xf32>
    %cst_4 = arith.constant 0.00347222225 : f32
    %6 = vector.broadcast %cst_4 : f32 to vector<1x128xf32>
    %7 = arith.mulf %5, %6 : vector<1x128xf32>
    %8 = vector.broadcast %7 : vector<1x128xf32> to vector<288x128xf32>
    %9 = arith.subf %3, %8 : vector<288x128xf32>
    %10 = arith.mulf %9, %9 : vector<288x128xf32>
    %cst_5 = arith.constant dense<0.000000e+00> : vector<128xf32>
    %11 = vector.multi_reduction <add>, %10, %cst_5 [0] : vector<288x128xf32> to vector<128xf32>
    %12 = vector.shape_cast %11 : vector<128xf32> to vector<1x128xf32>
    %cst_6 = arith.constant 0.00347222225 : f32
    %13 = vector.broadcast %cst_6 : f32 to vector<1x128xf32>
    %14 = arith.mulf %12, %13 : vector<1x128xf32>
    %c0_7 = arith.constant 0 : index
    %c0_8 = arith.constant 0 : index
    %15 = vector.load %arg2[%c0_7, %c0_8] : memref<1x128xf32, #tpu.memory_space<vmem>>, vector<1x128xf32>
    %cst_9 = arith.constant 9.99999974E-6 : f32
    %16 = vector.broadcast %cst_9 : f32 to vector<1x128xf32>
    %17 = arith.addf %14, %16 : vector<1x128xf32>
    %18 = math.rsqrt %17 : vector<1x128xf32>
    %19 = arith.mulf %15, %18 : vector<1x128xf32>
    %20 = vector.broadcast %19 : vector<1x128xf32> to vector<288x128xf32>
    %21 = arith.mulf %9, %20 : vector<288x128xf32>
    %c0_10 = arith.constant 0 : index
    %c0_11 = arith.constant 0 : index
    %22 = vector.load %arg3[%c0_10, %c0_11] : memref<1x128xf32, #tpu.memory_space<vmem>>, vector<1x128xf32>
    %23 = vector.broadcast %22 : vector<1x128xf32> to vector<288x128xf32>
    %24 = arith.addf %21, %23 : vector<288x128xf32>
    %cst_12 = arith.constant 0.000000e+00 : f32
    %25 = vector.broadcast %cst_12 : f32 to vector<288x128xf32>
    %26 = arith.maximumf %24, %25 : vector<288x128xf32>
    %c0_13 = arith.constant 0 : index
    %c0_14 = arith.constant 0 : index
    %27 = vector.load %arg4[%c0_13, %c0_14] : memref<288x128xf32, #tpu.memory_space<vmem>>, vector<288x128xf32>
    tpu.vector_store %arg4[%c0_13, %c0_14], %26 {strides = array<i32>} : memref<288x128xf32, #tpu.memory_space<vmem>>, vector<288x128xf32>,
    return
  }
}

module attributes {stable_mosaic.version = 11 : i64} {
  func.func @conv_block_kernel(%arg0: memref<128x256xf32, #tpu.memory_space<vmem>>, %arg1: memref<256x128xbf16, #tpu.memory_space<vmem>>, %arg2: memref<1x128xf32, #tpu.memory_space<vmem>>, %arg3: memref<1x128xf32, #tpu.memory_space<vmem>>, %arg4: memref<128x128xf32, #tpu.memory_space<vmem>>) attributes {dimension_semantics = [], scalar_prefetch = 0 : i64, scratch_operands = 0 : i64, tpu.core_type = #tpu.core_type<tc>} {
    %c0 = arith.constant 0 : index
    %c0_0 = arith.constant 0 : index
    %0 = vector.load %arg0[%c0, %c0_0] : memref<128x256xf32, #tpu.memory_space<vmem>>, vector<128x256xf32>
    %1 = arith.truncf %0 : vector<128x256xf32> to vector<128x256xbf16>
    %c0_1 = arith.constant 0 : index
    %c0_2 = arith.constant 0 : index
    %2 = vector.load %arg1[%c0_1, %c0_2] : memref<256x128xbf16, #tpu.memory_space<vmem>>, vector<256x128xbf16>
    %cst = arith.constant dense<0.000000e+00> : vector<128x128xf32>
    %3 = tpu.matmul %1, %2, %cst {dimension_numbers = #tpu.dot_dimension_numbers<[1], [0], [0], [1], [0, 0, 1, 1], [], []>} : vector<128x256xbf16>, vector<256x128xbf16>, vector<128x128xf32> -> vector<128x128xf32>
    %cst_3 = arith.constant dense<0.000000e+00> : vector<128xf32>
    %4 = vector.multi_reduction <add>, %3, %cst_3 [0] : vector<128x128xf32> to vector<128xf32>
    %5 = vector.shape_cast %4 : vector<128xf32> to vector<1x128xf32>
    %cst_4 = arith.constant 7.812500e-03 : f32
    %6 = vector.broadcast %cst_4 : f32 to vector<1x128xf32>
    %7 = arith.mulf %5, %6 : vector<1x128xf32>
    %8 = vector.broadcast %7 : vector<1x128xf32> to vector<128x128xf32>
    %9 = arith.subf %3, %8 : vector<128x128xf32>
    %10 = arith.mulf %9, %9 : vector<128x128xf32>
    %cst_5 = arith.constant dense<0.000000e+00> : vector<128xf32>
    %11 = vector.multi_reduction <add>, %10, %cst_5 [0] : vector<128x128xf32> to vector<128xf32>
    %12 = vector.shape_cast %11 : vector<128xf32> to vector<1x128xf32>
    %cst_6 = arith.constant 7.812500e-03 : f32
    %13 = vector.broadcast %cst_6 : f32 to vector<1x128xf32>
    %14 = arith.mulf %12, %13 : vector<1x128xf32>
    %c0_7 = arith.constant 0 : index
    %c0_8 = arith.constant 0 : index
    %15 = vector.load %arg2[%c0_7, %c0_8] : memref<1x128xf32, #tpu.memory_space<vmem>>, vector<1x128xf32>
    %cst_9 = arith.constant 9.99999974E-6 : f32
    %16 = vector.broadcast %cst_9 : f32 to vector<1x128xf32>
    %17 = arith.addf %14, %16 : vector<1x128xf32>
    %18 = math.rsqrt %17 : vector<1x128xf32>
    %19 = arith.mulf %15, %18 : vector<1x128xf32>
    %20 = vector.broadcast %19 : vector<1x128xf32> to vector<128x128xf32>
    %21 = arith.mulf %9, %20 : vector<128x128xf32>
    %c0_10 = arith.constant 0 : index
    %c0_11 = arith.constant 0 : index
    %22 = vector.load %arg3[%c0_10, %c0_11] : memref<1x128xf32, #tpu.memory_space<vmem>>, vector<1x128xf32>
    %23 = vector.broadcast %22 : vector<1x128xf32> to vector<128x128xf32>
    %24 = arith.addf %21, %23 : vector<128x128xf32>
    %cst_12 = arith.constant 0.000000e+00 : f32
    %25 = vector.broadcast %cst_12 : f32 to vector<128x128xf32>
    %26 = arith.maximumf %24, %25 : vector<128x128xf32>
    %c0_13 = arith.constant 0 : index
    %c0_14 = arith.constant 0 : index
    %27 = vector.load %arg4[%c0_13, %c0_14] : memref<128x128xf32, #tpu.memory_space<vmem>>, vector<128x128xf32>
    tpu.vector_store %arg4[%c0_13, %c0_14], %26 {strides = array<i32>} : memref<128x128xf32, #tpu.memory_space<vmem>>, vector<128x128xf32>,
    return
  }
}

module attributes {stable_mosaic.version = 11 : i64} {
  func.func @classifier_kernel(%arg0: memref<8x256xf32, #tpu.memory_space<vmem>>, %arg1: memref<8x1xf32, #tpu.memory_space<vmem>>, %arg2: memref<256x256xbf16, #tpu.memory_space<vmem>>, %arg3: memref<1x256xf32, #tpu.memory_space<vmem>>, %arg4: memref<1x256xf32, #tpu.memory_space<vmem>>, %arg5: memref<256x128xbf16, #tpu.memory_space<vmem>>, %arg6: memref<1x128xf32, #tpu.memory_space<vmem>>, %arg7: memref<1x128xf32, #tpu.memory_space<vmem>>, %arg8: memref<128x128xbf16, #tpu.memory_space<vmem>>, %arg9: memref<1x128xf32, #tpu.memory_space<vmem>>, %arg10: memref<8x128xf32, #tpu.memory_space<vmem>>) attributes {dimension_semantics = [], scalar_prefetch = 0 : i64, scratch_operands = 0 : i64, tpu.core_type = #tpu.core_type<tc>} {
    %c0 = arith.constant 0 : index
    %c0_0 = arith.constant 0 : index
    %0 = vector.load %arg1[%c0, %c0_0] : memref<8x1xf32, #tpu.memory_space<vmem>>, vector<8x1xf32>
    %c0_1 = arith.constant 0 : index
    %c0_2 = arith.constant 0 : index
    %1 = vector.load %arg0[%c0_1, %c0_2] : memref<8x256xf32, #tpu.memory_space<vmem>>, vector<8x256xf32>
    %2 = arith.truncf %1 : vector<8x256xf32> to vector<8x256xbf16>
    %c0_3 = arith.constant 0 : index
    %c0_4 = arith.constant 0 : index
    %3 = vector.load %arg2[%c0_3, %c0_4] : memref<256x256xbf16, #tpu.memory_space<vmem>>, vector<256x256xbf16>
    %cst = arith.constant dense<0.000000e+00> : vector<8x256xf32>
    %4 = tpu.matmul %2, %3, %cst {dimension_numbers = #tpu.dot_dimension_numbers<[1], [0], [0], [1], [0, 0, 1, 1], [], []>} : vector<8x256xbf16>, vector<256x256xbf16>, vector<8x256xf32> -> vector<8x256xf32>
    %c0_5 = arith.constant 0 : index
    %c0_6 = arith.constant 0 : index
    %5 = vector.load %arg3[%c0_5, %c0_6] : memref<1x256xf32, #tpu.memory_space<vmem>>, vector<1x256xf32>
    %c0_7 = arith.constant 0 : index
    %c0_8 = arith.constant 0 : index
    %6 = vector.load %arg4[%c0_7, %c0_8] : memref<1x256xf32, #tpu.memory_space<vmem>>, vector<1x256xf32>
    %7 = vector.broadcast %0 : vector<8x1xf32> to vector<8x256xf32>
    %8 = arith.mulf %4, %7 : vector<8x256xf32>
    %cst_9 = arith.constant dense<0.000000e+00> : vector<256xf32>
    %9 = vector.multi_reduction <add>, %8, %cst_9 [0] : vector<8x256xf32> to vector<256xf32>
    %10 = vector.shape_cast %9 : vector<256xf32> to vector<1x256xf32>
    %cst_10 = arith.constant 5.000000e-01 : f32
    %11 = vector.broadcast %cst_10 : f32 to vector<1x256xf32>
    %12 = arith.mulf %10, %11 : vector<1x256xf32>
    %13 = vector.broadcast %12 : vector<1x256xf32> to vector<8x256xf32>
    %14 = arith.subf %4, %13 : vector<8x256xf32>
    %15 = vector.broadcast %0 : vector<8x1xf32> to vector<8x256xf32>
    %16 = arith.mulf %14, %15 : vector<8x256xf32>
    %17 = arith.mulf %16, %16 : vector<8x256xf32>
    %cst_11 = arith.constant dense<0.000000e+00> : vector<256xf32>
    %18 = vector.multi_reduction <add>, %17, %cst_11 [0] : vector<8x256xf32> to vector<256xf32>
    %19 = vector.shape_cast %18 : vector<256xf32> to vector<1x256xf32>
    %cst_12 = arith.constant 5.000000e-01 : f32
    %20 = vector.broadcast %cst_12 : f32 to vector<1x256xf32>
    %21 = arith.mulf %19, %20 : vector<1x256xf32>
    %22 = vector.broadcast %12 : vector<1x256xf32> to vector<8x256xf32>
    %23 = arith.subf %4, %22 : vector<8x256xf32>
    %cst_13 = arith.constant 9.99999974E-6 : f32
    %24 = vector.broadcast %cst_13 : f32 to vector<1x256xf32>
    %25 = arith.addf %21, %24 : vector<1x256xf32>
    %26 = math.rsqrt %25 : vector<1x256xf32>
    %27 = arith.mulf %5, %26 : vector<1x256xf32>
    %28 = vector.broadcast %27 : vector<1x256xf32> to vector<8x256xf32>
    %29 = arith.mulf %23, %28 : vector<8x256xf32>
    %30 = vector.broadcast %6 : vector<1x256xf32> to vector<8x256xf32>
    %31 = arith.addf %29, %30 : vector<8x256xf32>
    %cst_14 = arith.constant 0.000000e+00 : f32
    %32 = vector.broadcast %cst_14 : f32 to vector<8x256xf32>
    %33 = arith.maximumf %31, %32 : vector<8x256xf32>
    %34 = arith.truncf %33 : vector<8x256xf32> to vector<8x256xbf16>
    %c0_15 = arith.constant 0 : index
    %c0_16 = arith.constant 0 : index
    %35 = vector.load %arg5[%c0_15, %c0_16] : memref<256x128xbf16, #tpu.memory_space<vmem>>, vector<256x128xbf16>
    %cst_17 = arith.constant dense<0.000000e+00> : vector<8x128xf32>
    %36 = tpu.matmul %34, %35, %cst_17 {dimension_numbers = #tpu.dot_dimension_numbers<[1], [0], [0], [1], [0, 0, 1, 1], [], []>} : vector<8x256xbf16>, vector<256x128xbf16>, vector<8x128xf32> -> vector<8x128xf32>
    %c0_18 = arith.constant 0 : index
    %c0_19 = arith.constant 0 : index
    %37 = vector.load %arg6[%c0_18, %c0_19] : memref<1x128xf32, #tpu.memory_space<vmem>>, vector<1x128xf32>
    %c0_20 = arith.constant 0 : index
    %c0_21 = arith.constant 0 : index
    %38 = vector.load %arg7[%c0_20, %c0_21] : memref<1x128xf32, #tpu.memory_space<vmem>>, vector<1x128xf32>
    %39 = vector.broadcast %0 : vector<8x1xf32> to vector<8x128xf32>
    %40 = arith.mulf %36, %39 : vector<8x128xf32>
    %cst_22 = arith.constant dense<0.000000e+00> : vector<128xf32>
    %41 = vector.multi_reduction <add>, %40, %cst_22 [0] : vector<8x128xf32> to vector<128xf32>
    %42 = vector.shape_cast %41 : vector<128xf32> to vector<1x128xf32>
    %cst_23 = arith.constant 5.000000e-01 : f32
    %43 = vector.broadcast %cst_23 : f32 to vector<1x128xf32>
    %44 = arith.mulf %42, %43 : vector<1x128xf32>
    %45 = vector.broadcast %44 : vector<1x128xf32> to vector<8x128xf32>
    %46 = arith.subf %36, %45 : vector<8x128xf32>
    %47 = vector.broadcast %0 : vector<8x1xf32> to vector<8x128xf32>
    %48 = arith.mulf %46, %47 : vector<8x128xf32>
    %49 = arith.mulf %48, %48 : vector<8x128xf32>
    %cst_24 = arith.constant dense<0.000000e+00> : vector<128xf32>
    %50 = vector.multi_reduction <add>, %49, %cst_24 [0] : vector<8x128xf32> to vector<128xf32>
    %51 = vector.shape_cast %50 : vector<128xf32> to vector<1x128xf32>
    %cst_25 = arith.constant 5.000000e-01 : f32
    %52 = vector.broadcast %cst_25 : f32 to vector<1x128xf32>
    %53 = arith.mulf %51, %52 : vector<1x128xf32>
    %54 = vector.broadcast %44 : vector<1x128xf32> to vector<8x128xf32>
    %55 = arith.subf %36, %54 : vector<8x128xf32>
    %cst_26 = arith.constant 9.99999974E-6 : f32
    %56 = vector.broadcast %cst_26 : f32 to vector<1x128xf32>
    %57 = arith.addf %53, %56 : vector<1x128xf32>
    %58 = math.rsqrt %57 : vector<1x128xf32>
    %59 = arith.mulf %37, %58 : vector<1x128xf32>
    %60 = vector.broadcast %59 : vector<1x128xf32> to vector<8x128xf32>
    %61 = arith.mulf %55, %60 : vector<8x128xf32>
    %62 = vector.broadcast %38 : vector<1x128xf32> to vector<8x128xf32>
    %63 = arith.addf %61, %62 : vector<8x128xf32>
    %cst_27 = arith.constant 0.000000e+00 : f32
    %64 = vector.broadcast %cst_27 : f32 to vector<8x128xf32>
    %65 = arith.maximumf %63, %64 : vector<8x128xf32>
    %66 = arith.truncf %65 : vector<8x128xf32> to vector<8x128xbf16>
    %c0_28 = arith.constant 0 : index
    %c0_29 = arith.constant 0 : index
    %67 = vector.load %arg8[%c0_28, %c0_29] : memref<128x128xbf16, #tpu.memory_space<vmem>>, vector<128x128xbf16>
    %cst_30 = arith.constant dense<0.000000e+00> : vector<8x128xf32>
    %68 = tpu.matmul %66, %67, %cst_30 {dimension_numbers = #tpu.dot_dimension_numbers<[1], [0], [0], [1], [0, 0, 1, 1], [], []>} : vector<8x128xbf16>, vector<128x128xbf16>, vector<8x128xf32> -> vector<8x128xf32>
    %c0_31 = arith.constant 0 : index
    %c0_32 = arith.constant 0 : index
    %69 = vector.load %arg9[%c0_31, %c0_32] : memref<1x128xf32, #tpu.memory_space<vmem>>, vector<1x128xf32>
    %70 = vector.broadcast %69 : vector<1x128xf32> to vector<8x128xf32>
    %71 = arith.addf %68, %70 : vector<8x128xf32>
    %c0_33 = arith.constant 0 : index
    %c0_34 = arith.constant 0 : index
    %72 = vector.load %arg10[%c0_33, %c0_34] : memref<8x128xf32, #tpu.memory_space<vmem>>, vector<8x128xf32>
    tpu.vector_store %arg10[%c0_33, %c0_34], %71 {strides = array<i32>} : memref<8x128xf32, #tpu.memory_space<vmem>>, vector<8x128xf32>,
    return
  }
}

</mosaic_0001>

<bundles_post_ra>
// kernel: cnn_forward.3
= control target key start
LH: loop header
LB: loop body
LE: loop exit
PB: predicated region body
PF: predicated region fallthrough
CT: control target
= control target key end

     0   :  { %s1358_s1 = inlined_call_operand.vmem [shape: bf16[128,128], index: 1, kind: input, shape index: {}]   ;;  %s1359_s0 = inlined_call_operand.vmem [shape: f32[288,128], index: 0, kind: input, shape index: {}]   ;;  %s1360_s2 = inlined_call_operand.vmem [shape: f32[1,128], index: 2, kind: input, shape index: {}]   ;;  %s1361_s3 = inlined_call_operand.vmem [shape: f32[1,128], index: 3, kind: input, shape index: {}]   ;;  %s1362_s4 = inlined_call_operand.vmem [shape: f32[288,128], index: 4, kind: output, shape index: {}]  }
   0x1   :  { %v737_v0 = vld [vmem:[%s1358_s1] sm:$0xff]   ;;  %v738_v1 = vld [vmem:[%s1358_s1 + $0x8] sm:$0xff]   ;;  %v739_v2 = vld [vmem:[%s1358_s1 + $0x10] sm:$0xff]  }
   0x2   :  { %669 = vmatprep.subr.bf16.mxu0 %v737_v0  ;;  %721 = vmatprep.subr.bf16.mxu1 %v737_v0  ;;  %v740_v3 = vld [vmem:[%s1358_s1 + $0x18] sm:$0xff]   ;;  %v18_v4 = vld [vmem:[%s1359_s0] sm:$0xff]  ;;  %v19_v5 = vld [vmem:[%s1359_s0 + $0x8] sm:$0xff] }
   0x3   :  { %670 = vmatpush3.bf16.msra.mxu0 %v737_v0  ;;  %729 = vmatpush3.bf16.msra.mxu1 %v737_v0  ;;  %v54_v6 = vpack.c.bf16 %v19_v5, %v18_v4  ;;  %v741_v7 = vld [vmem:[%s1358_s1 + $0x20] sm:$0xff]   ;;  %v39_v9 = vld [vmem:[%s1359_s0 + $0xa8] sm:$0xff]  ;;  %v743_v12 = vld [vmem:[%s1358_s1 + $0x30] sm:$0xff]  }
   0x4   :  { %671 = vmatprep.subr.bf16.mxu0 %v738_v1  ;;  %722 = vmatprep.subr.bf16.mxu1 %v738_v1  ;;  %v38_v8 = vld [vmem:[%s1359_s0 + $0xa0] sm:$0xff]  ;;  %v742_v10 = vld [vmem:[%s1358_s1 + $0x28] sm:$0xff]   ;;  %v744_v13 = vld [vmem:[%s1358_s1 + $0x38] sm:$0xff]  }
   0x5   :  { %685 = vmatprep.mubr.bf16.mxu0 %v54_v6  ;;  %v64_v11 = vpack.c.bf16 %v39_v9, %v38_v8  ;;  %v20_v14 = vld [vmem:[%s1359_s0 + $0x10] sm:$0xff]  ;;  %v21_v15 = vld [vmem:[%s1359_s0 + $0x18] sm:$0xff]  ;;  %v22_v16 = vld [vmem:[%s1359_s0 + $0x20] sm:$0xff] }
   0x6   :  { %v23_v17 = vld [vmem:[%s1359_s0 + $0x28] sm:$0xff]  ;;  %v40_v18 = vld [vmem:[%s1359_s0 + $0xb0] sm:$0xff]  ;;  %v41_v19 = vld [vmem:[%s1359_s0 + $0xb8] sm:$0xff]  ;;  %v55_v22 = vpack.c.bf16 %v21_v15, %v20_v14 }
   0x7   :  { %672 = vmatpush3.bf16.msra.mxu0 %v738_v1  ;;  %730 = vmatpush3.bf16.msra.mxu1 %v738_v1  ;;  %v42_v20 = vld [vmem:[%s1359_s0 + $0xc0] sm:$0xff]  ;;  %v43_v21 = vld [vmem:[%s1359_s0 + $0xc8] sm:$0xff]  ;;  %v56_v23 = vpack.c.bf16 %v23_v17, %v22_v16  ;;  %v65_v24 = vpack.c.bf16 %v41_v19, %v40_v18  ;;  %v24_v26 = vld [vmem:[%s1359_s0 + $0x30] sm:$0xff] }
   0x8   :  { %673 = vmatprep.subr.bf16.mxu0 %v739_v2  ;;  %723 = vmatprep.subr.bf16.mxu1 %v739_v2  ;;  %v66_v25 = vpack.c.bf16 %v43_v21, %v42_v20  ;;  %v25_v27 = vld [vmem:[%s1359_s0 + $0x38] sm:$0xff]  ;;  %v26_v28 = vld [vmem:[%s1359_s0 + $0x40] sm:$0xff]  ;;  %v27_v29 = vld [vmem:[%s1359_s0 + $0x48] sm:$0xff] }
   0x9   :  { %705 = vmatprep.mubr.bf16.mxu1 %v64_v11  ;;  %v44_v30 = vld [vmem:[%s1359_s0 + $0xd0] sm:$0xff]  ;;  %v45_v31 = vld [vmem:[%s1359_s0 + $0xd8] sm:$0xff]  ;;  %v46_v32 = vld [vmem:[%s1359_s0 + $0xe0] sm:$0xff]  ;;  %v57_v34 = vpack.c.bf16 %v25_v27, %v24_v26  ;;  %v58_v35 = vpack.c.bf16 %v27_v29, %v26_v28 }
   0xa   :  { %v47_v33 = vld [vmem:[%s1359_s0 + $0xe8] sm:$0xff]  ;;  %v67_v36 = vpack.c.bf16 %v45_v31, %v44_v30  ;;  %v28_v38 = vld [vmem:[%s1359_s0 + $0x50] sm:$0xff]  ;;  %v29_v39 = vld [vmem:[%s1359_s0 + $0x58] sm:$0xff] }
   0xb   :  { %674 = vmatpush3.bf16.msra.mxu0 %v739_v2  ;;  %731 = vmatpush3.bf16.msra.mxu1 %v739_v2  ;;  %v68_v37 = vpack.c.bf16 %v47_v33, %v46_v32  ;;  %v30_v40 = vld [vmem:[%s1359_s0 + $0x60] sm:$0xff]  ;;  %v31_v41 = vld [vmem:[%s1359_s0 + $0x68] sm:$0xff]  ;;  %v48_v42 = vld [vmem:[%s1359_s0 + $0xf0] sm:$0xff]  ;;  %v59_v46 = vpack.c.bf16 %v29_v39, %v28_v38 }
   0xc   :  { %675 = vmatprep.subr.bf16.mxu0 %v740_v3  ;;  %724 = vmatprep.subr.bf16.mxu1 %v740_v3  ;;  %v49_v43 = vld [vmem:[%s1359_s0 + $0xf8] sm:$0xff]  ;;  %v50_v44 = vld [vmem:[%s1359_s0 + $0x100] sm:$0xff]  ;;  %v51_v45 = vld [vmem:[%s1359_s0 + $0x108] sm:$0xff]  ;;  %v60_v47 = vpack.c.bf16 %v31_v41, %v30_v40 }
   0xd   :  { %v69_v48 = vpack.c.bf16 %v49_v43, %v48_v42  ;;  %v70_v49 = vpack.c.bf16 %v51_v45, %v50_v44  ;;  %v32_v50 = vld [vmem:[%s1359_s0 + $0x70] sm:$0xff]  ;;  %v33_v51 = vld [vmem:[%s1359_s0 + $0x78] sm:$0xff]  ;;  %v34_v52 = vld [vmem:[%s1359_s0 + $0x80] sm:$0xff] }
   0xe   :  { %v35_v53 = vld [vmem:[%s1359_s0 + $0x88] sm:$0xff]  ;;  %v52_v54 = vld [vmem:[%s1359_s0 + $0x110] sm:$0xff]  ;;  %v53_v55 = vld [vmem:[%s1359_s0 + $0x118] sm:$0xff]  ;;  %v61_v56 = vpack.c.bf16 %v33_v51, %v32_v50 }
   0xf   :  { %676 = vmatpush3.bf16.msra.mxu0 %v740_v3  ;;  %732 = vmatpush3.bf16.msra.mxu1 %v740_v3  ;;  %v62_v57 = vpack.c.bf16 %v35_v53, %v34_v52  ;;  %v71_v58 = vpack.c.bf16 %v53_v55, %v52_v54  ;;  %v36_v59 = vld [vmem:[%s1359_s0 + $0x90] sm:$0xff]  ;;  %v37_v60 = vld [vmem:[%s1359_s0 + $0x98] sm:$0xff] }
  0x10   :  { %677 = vmatprep.subr.bf16.mxu0 %v741_v7  ;;  %725 = vmatprep.subr.bf16.mxu1 %v741_v7  ;;  %v63_v61 = vpack.c.bf16 %v37_v60, %v36_v59 }
  0x13   :  { %678 = vmatpush3.bf16.msra.mxu0 %v741_v7  ;;  %733 = vmatpush3.bf16.msra.mxu1 %v741_v7 }
  0x14   :  { %679 = vmatprep.subr.bf16.mxu0 %v742_v10  ;;  %726 = vmatprep.subr.bf16.mxu1 %v742_v10 }
  0x17   :  { %680 = vmatpush3.bf16.msra.mxu0 %v742_v10  ;;  %734 = vmatpush3.bf16.msra.mxu1 %v742_v10 }
  0x18   :  { %681 = vmatprep.subr.bf16.mxu0 %v743_v12  ;;  %727 = vmatprep.subr.bf16.mxu1 %v743_v12 }
  0x1b   :  { %682 = vmatpush3.bf16.msra.mxu0 %v743_v12  ;;  %735 = vmatpush3.bf16.msra.mxu1 %v743_v12 }
  0x1c   :  { %683 = vmatprep.subr.bf16.mxu0 %v744_v13  ;;  %728 = vmatprep.subr.bf16.mxu1 %v744_v13 }
  0x1f   :  { %684 = vmatpush3.bf16.msra.mxu0 %v744_v13  ;;  %736 = vmatpush3.bf16.msra.mxu1 %v744_v13 }
  0x22   :  { %686 = vmatmul.mubr.bf16.vlgmr.msra.gmra.mrb[0].mxu0 %v55_v22  ;;  %706 = vmatmul.mubr.bf16.vlgmr.msra.gmra.mrb[0].mxu1 %v65_v24 }
  0x23   :  { %689 = vmatprep.mubr.bf16.mxu0 %v56_v23  ;;  %709 = vmatprep.mubr.bf16.mxu1 %v66_v25 }
  0x2a   :  { %690 = vmatmul.mubr.bf16.gmra.mrb[4].mxu0 %v57_v34  ;;  %710 = vmatmul.mubr.bf16.gmra.mrb[4].mxu1 %v67_v36 }
  0x2b   :  { %693 = vmatprep.mubr.bf16.mxu0 %v58_v35  ;;  %713 = vmatprep.mubr.bf16.mxu1 %v68_v37 }
  0x32   :  { %694 = vmatmul.mubr.bf16.gmra.mrb[8].mxu0 %v59_v46  ;;  %714 = vmatmul.mubr.bf16.gmra.mrb[8].mxu1 %v69_v48 }
  0x33   :  { %697 = vmatprep.mubr.bf16.mxu0 %v60_v47  ;;  %717 = vmatprep.mubr.bf16.mxu1 %v70_v49 }
  0x3a   :  { %698 = vmatmul.mubr.bf16.gmra.mrb[12].mxu0 %v61_v56  ;;  %718 = vmatmul.mubr.bf16.gmra.mrb[12].mxu1 %v71_v58 }
  0x3b   :  { %701 = vmatprep.mubr.bf16.mxu0 %v62_v57 }
  0x42   :  { %702 = vmatmul.mubr.bf16.gmra.mrb[16].mxu0 %v63_v61 }
  0xf5   :  { %v904_v62 = vpop.f32.mrb[0].mxu0  ;;  %v908_v0 = vpop.f32.mrb[0].mxu1 }
  0xf6   :  { %v906_v63 = vpop.f32.mrb[1].mxu0  ;;  %v912_v2 = vpop.f32.mrb[1].mxu1 }
  0xf7   :  { %v910_v1 = vpop.f32.mrb[2].mxu0  ;;  %v916_v4 = vpop.f32.mrb[2].mxu1 }
  0xf8   :  { %v914_v3 = vpop.f32.mrb[3].mxu0  ;;  %v920_v6 = vpop.f32.mrb[3].mxu1 }
  0xf9   :  { %v313_v5 = vadd.f32 %v914_v3, %v906_v63 }
  0xfb   :  { %v314_v7 = vadd.f32 %v904_v62, %v313_v5 }
  0xfd   :  { %v923_v8 = vpop.f32.mrb[4].mxu0  ;;  %v315_v9 = vadd.f32 %v910_v1, %v314_v7  ;;  %v928_v11 = vpop.f32.mrb[4].mxu1 }
  0xfe   :  { %v926_v10 = vpop.f32.mrb[5].mxu0  ;;  %v933_v14 = vpop.f32.mrb[5].mxu1 }
  0xff   :  { %v316_v12 = vadd.f32 %v315_v9, %v926_v10  ;;  %v931_v13 = vpop.f32.mrb[6].mxu0  ;;  %v937_v16 = vpop.f32.mrb[6].mxu1 }
 0x100   :  { %v935_v15 = vpop.f32.mrb[7].mxu0  ;;  %v940_v18 = vpop.f32.mrb[7].mxu1 }
 0x101   :  { %v317_v17 = vadd.f32 %v316_v12, %v935_v15 }
 0x103   :  { %v318_v19 = vadd.f32 %v923_v8, %v317_v17 }
 0x105   :  { %v943_v20 = vpop.f32.mrb[8].mxu0  ;;  %v319_v21 = vadd.f32 %v931_v13, %v318_v19  ;;  %v946_v23 = vpop.f32.mrb[8].mxu1 }
 0x106   :  { %v202_v22 = vpop.f32.mrb[9].mxu0  ;;  %v948_v26 = vpop.f32.mrb[9].mxu1 }
 0x107   :  { %v320_v24 = vadd.f32 %v319_v21, %v202_v22  ;;  %v696_v25 = vpop.f32.mrb[10].mxu0  ;;  %v950_v28 = vpop.f32.mrb[10].mxu1 }
 0x108   :  { %v205_v27 = vpop.f32.mrb[11].mxu0  ;;  %v952_v30 = vpop.f32.mrb[11].mxu1 }
 0x109   :  { %v321_v29 = vadd.f32 %v320_v24, %v205_v27 }
 0x10b   :  { %v322_v31 = vadd.f32 %v943_v20, %v321_v29 }
 0x10d   :  { %v699_v32 = vpop.f32.mrb[12].mxu0  ;;  %v323_v33 = vadd.f32 %v696_v25, %v322_v31  ;;  %v955_v35 = vpop.f32.mrb[12].mxu1 }
 0x10e   :  { %v218_v34 = vpop.f32.mrb[13].mxu0  ;;  %v957_v38 = vpop.f32.mrb[13].mxu1 }
 0x10f   :  { %v324_v36 = vadd.f32 %v323_v33, %v218_v34  ;;  %v700_v37 = vpop.f32.mrb[14].mxu0  ;;  %v959_v40 = vpop.f32.mrb[14].mxu1 }
 0x110   :  { %v221_v39 = vpop.f32.mrb[15].mxu0  ;;  %v961_v42 = vpop.f32.mrb[15].mxu1 }
 0x111   :  { %v325_v41 = vadd.f32 %v324_v36, %v221_v39 }
 0x113   :  { %v326_v43 = vadd.f32 %v699_v32, %v325_v41 }
 0x115   :  { %v703_v44 = vpop.f32.mrb[16].mxu0  ;;  %v327_v45 = vadd.f32 %v700_v37, %v326_v43 }
 0x116   :  { %v234_v46 = vpop.f32.mrb[17].mxu0 }
 0x117   :  { %v328_v47 = vadd.f32 %v327_v45, %v234_v46  ;;  %v704_v48 = vpop.f32.mrb[18].mxu0 }
 0x118   :  { %v237_v49 = vpop.f32.mrb[19].mxu0 }
 0x119   :  { %v329_v50 = vadd.f32 %v328_v47, %v237_v49 }
 0x11b   :  { %v330_v51 = vadd.f32 %v703_v44, %v329_v50 }
 0x11d   :  { %v331_v52 = vadd.f32 %v704_v48, %v330_v51 }
 0x11f   :  { %v332_v53 = vadd.f32 %v331_v52, %v912_v2 }
 0x121   :  { %v333_v54 = vadd.f32 %v332_v53, %v920_v6 }
 0x123   :  { %v334_v55 = vadd.f32 %v908_v0, %v333_v54 }
 0x125   :  { %v335_v56 = vadd.f32 %v916_v4, %v334_v55 }
 0x127   :  { %v336_v57 = vadd.f32 %v335_v56, %v933_v14 }
 0x129   :  { %v337_v58 = vadd.f32 %v336_v57, %v940_v18 }
 0x12b   :  { %v338_v59 = vadd.f32 %v928_v11, %v337_v58 }
 0x12d   :  { %v339_v60 = vadd.f32 %v937_v16, %v338_v59 }
 0x12f   :  { %v340_v61 = vadd.f32 %v339_v60, %v948_v26 }
 0x131   :  { %v341_v5 = vadd.f32 %v340_v61, %v952_v30 }
 0x133   :  { %v342_v7 = vadd.f32 %v946_v23, %v341_v5 }
 0x135   :  { %v343_v9 = vadd.f32 %v950_v28, %v342_v7 }
 0x137   :  { %v344_v12 = vadd.f32 %v343_v9, %v957_v38 }
 0x139   :  { %v345_v17 = vadd.f32 %v344_v12, %v961_v42 }
 0x13b   :  { %v346_v19 = vadd.f32 %v955_v35, %v345_v17 }
 0x13d   :  { %v347_v21 = vadd.f32 %v959_v40, %v346_v19 }
 0x13f   :  { %v348_v24 = vrot.slane %v347_v21, 4 }
 0x141   :  { %v349_v29 = vadd.f32 %v348_v24, %v347_v21 }
 0x143   :  { %v350_v31 = vrot.slane %v349_v29, 2 }
 0x145   :  { %v351_v33 = vadd.f32 %v350_v31, %v349_v29 }
 0x147   :  { %v352_v36 = vrot.slane %v351_v33, 1 }
 0x149   :  { %v353_v41 = vadd.f32 %v352_v36, %v351_v33 }
 0x14b   :  { %v354_v43 = vmul.f32 0.0034722222, %v353_v41 }
 0x14d   :  { %v980_v45 = vsub.f32 %v906_v63, %v354_v43  ;;  %v983_v47 = vsub.f32 %v914_v3, %v354_v43  ;;  %v986_v50 = vsub.f32 %v904_v62, %v354_v43  ;;  %v989_v51 = vsub.f32 %v910_v1, %v354_v43 }
 0x14e   :  { %v992_v52 = vsub.f32 %v926_v10, %v354_v43  ;;  %v995_v53 = vsub.f32 %v935_v15, %v354_v43  ;;  %v998_v54 = vsub.f32 %v923_v8, %v354_v43  ;;  %v1001_v63 = vsub.f32 %v931_v13, %v354_v43 }
 0x14f   :  { %v1003_v3 = vsub.f32 %v202_v22, %v354_v43  ;;  %v1005_v55 = vsub.f32 %v205_v27, %v354_v43  ;;  %v1008_v62 = vsub.f32 %v943_v20, %v354_v43  ;;  %v1010_v1 = vsub.f32 %v696_v25, %v354_v43 }
 0x150   :  { %v1012_v10 = vsub.f32 %v218_v34, %v354_v43  ;;  %v1014_v56 = vsub.f32 %v221_v39, %v354_v43  ;;  %v1016_v15 = vsub.f32 %v699_v32, %v354_v43  ;;  %v1018_v8 = vsub.f32 %v700_v37, %v354_v43 }
 0x151   :  { %v1020_v57 = vsub.f32 %v234_v46, %v354_v43  ;;  %v1022_v13 = vsub.f32 %v237_v49, %v354_v43  ;;  %v1024_v22 = vsub.f32 %v703_v44, %v354_v43  ;;  %v1026_v27 = vsub.f32 %v704_v48, %v354_v43 }
 0x152   :  { %v1029_v20 = vsub.f32 %v912_v2, %v354_v43  ;;  %v1032_v25 = vsub.f32 %v920_v6, %v354_v43  ;;  %v1035_v34 = vsub.f32 %v908_v0, %v354_v43  ;;  %v1038_v32 = vsub.f32 %v916_v4, %v354_v43 }
 0x153   :  { %v1041_v37 = vsub.f32 %v933_v14, %v354_v43  ;;  %v1044_v39 = vsub.f32 %v940_v18, %v354_v43  ;;  %v1047_v44 = vsub.f32 %v928_v11, %v354_v43  ;;  %v1050_v2 = vsub.f32 %v937_v16, %v354_v43 }
 0x154   :  { %v1053_v6 = vsub.f32 %v948_v26, %v354_v43  ;;  %v1056_v0 = vsub.f32 %v952_v30, %v354_v43  ;;  %v1059_v4 = vsub.f32 %v946_v23, %v354_v43  ;;  %v1062_v14 = vsub.f32 %v950_v28, %v354_v43 }
 0x155   :  { %v1065_v18 = vsub.f32 %v957_v38, %v354_v43  ;;  %v1068_v11 = vsub.f32 %v961_v42, %v354_v43  ;;  %v1071_v16 = vsub.f32 %v955_v35, %v354_v43  ;;  %v1074_v26 = vsub.f32 %v959_v40, %v354_v43 }
 0x156   :  { %v391_v30 = vmul.f32 %v980_v45, %v980_v45  ;;  %v392_v23 = vmul.f32 %v983_v47, %v983_v47  ;;  %v393_v28 = vmul.f32 %v986_v50, %v986_v50  ;;  %v394_v42 = vmul.f32 %v989_v51, %v989_v51 }
 0x157   :  { %v395_v35 = vmul.f32 %v992_v52, %v992_v52  ;;  %v396_v40 = vmul.f32 %v995_v53, %v995_v53  ;;  %v397_v58 = vmul.f32 %v998_v54, %v998_v54  ;;  %v398_v60 = vmul.f32 %v1001_v63, %v1001_v63 }
 0x158   :  { %v427_v38 = vadd.f32 %v392_v23, %v391_v30  ;;  %v399_v5 = vmul.f32 %v1003_v3, %v1003_v3  ;;  %v400_v9 = vmul.f32 %v1005_v55, %v1005_v55  ;;  %v401_v17 = vmul.f32 %v1008_v62, %v1008_v62 }
 0x159   :  { %v402_v21 = vmul.f32 %v1010_v1, %v1010_v1  ;;  %v403_v29 = vmul.f32 %v1012_v10, %v1012_v10  ;;  %v404_v33 = vmul.f32 %v1014_v56, %v1014_v56  ;;  %v405_v41 = vmul.f32 %v1016_v15, %v1016_v15 }
 0x15a   :  { %v428_v46 = vadd.f32 %v427_v38, %v393_v28  ;;  %v406_v30 = vmul.f32 %v1018_v8, %v1018_v8  ;;  %v407_v28 = vmul.f32 %v1020_v57, %v1020_v57 }
 0x15c   :  { %v429_v48 = vadd.f32 %v428_v46, %v394_v42  ;;  %v408_v42 = vmul.f32 %v1022_v13, %v1022_v13 }
 0x15e   :  { %v430_v49 = vadd.f32 %v429_v48, %v395_v35  ;;  %v409_v35 = vmul.f32 %v1024_v22, %v1024_v22 }
 0x160   :  { %v431_v59 = vadd.f32 %v430_v49, %v396_v40  ;;  %v410_v40 = vmul.f32 %v1026_v27, %v1026_v27 }
 0x162   :  { %v432_v61 = vadd.f32 %v431_v59, %v397_v58  ;;  %v411_v58 = vmul.f32 %v1029_v20, %v1029_v20 }
 0x164   :  { %v433_v7 = vadd.f32 %v432_v61, %v398_v60  ;;  %v412_v60 = vmul.f32 %v1032_v25, %v1032_v25 }
 0x166   :  { %v434_v12 = vadd.f32 %v433_v7, %v399_v5  ;;  %v413_v5 = vmul.f32 %v1035_v34, %v1035_v34 }
 0x168   :  { %v435_v19 = vadd.f32 %v434_v12, %v400_v9  ;;  %v414_v9 = vmul.f32 %v1038_v32, %v1038_v32 }
 0x16a   :  { %v436_v24 = vadd.f32 %v435_v19, %v401_v17  ;;  %v415_v17 = vmul.f32 %v1041_v37, %v1041_v37 }
 0x16c   :  { %v437_v31 = vadd.f32 %v436_v24, %v402_v21  ;;  %v416_v21 = vmul.f32 %v1044_v39, %v1044_v39 }
 0x16e   :  { %v438_v36 = vadd.f32 %v437_v31, %v403_v29  ;;  %v417_v29 = vmul.f32 %v1047_v44, %v1047_v44 }
 0x170   :  { %v439_v43 = vadd.f32 %v438_v36, %v404_v33  ;;  %v418_v33 = vmul.f32 %v1050_v2, %v1050_v2 }
 0x172   :  { %v440_v23 = vadd.f32 %v439_v43, %v405_v41  ;;  %v419_v41 = vmul.f32 %v1053_v6, %v1053_v6 }
 0x174   :  { %v441_v38 = vadd.f32 %v440_v23, %v406_v30  ;;  %v420_v30 = vmul.f32 %v1056_v0, %v1056_v0 }
 0x176   :  { %v442_v46 = vadd.f32 %v441_v38, %v407_v28  ;;  %v421_v28 = vmul.f32 %v1059_v4, %v1059_v4 }
 0x178   :  { %v443_v48 = vadd.f32 %v442_v46, %v408_v42  ;;  %v422_v42 = vmul.f32 %v1062_v14, %v1062_v14 }
 0x17a   :  { %v444_v49 = vadd.f32 %v443_v48, %v409_v35  ;;  %v423_v35 = vmul.f32 %v1065_v18, %v1065_v18 }
 0x17c   :  { %v445_v59 = vadd.f32 %v444_v49, %v410_v40  ;;  %v424_v40 = vmul.f32 %v1068_v11, %v1068_v11 }
 0x17e   :  { %v446_v61 = vadd.f32 %v445_v59, %v411_v58  ;;  %v425_v58 = vmul.f32 %v1071_v16, %v1071_v16 }
 0x180   :  { %v447_v7 = vadd.f32 %v446_v61, %v412_v60  ;;  %v426_v60 = vmul.f32 %v1074_v26, %v1074_v26 }
 0x182   :  { %v448_v12 = vadd.f32 %v447_v7, %v413_v5 }
 0x184   :  { %v449_v19 = vadd.f32 %v448_v12, %v414_v9 }
 0x186   :  { %v450_v24 = vadd.f32 %v449_v19, %v415_v17 }
 0x188   :  { %v451_v31 = vadd.f32 %v450_v24, %v416_v21 }
 0x18a   :  { %v452_v36 = vadd.f32 %v451_v31, %v417_v29  ;;  %v474_v31 = vlaneseq }
 0x18c   :  { %v453_v43 = vadd.f32 %v452_v36, %v418_v33  ;;  %v475_v33 = vshrl.u32 %v474_v31, 7  ;;  %v469_v36 = vld [vmem:[%s1360_s2] sm:$0x1] }
 0x18e   :  { %v454_v23 = vadd.f32 %v453_v43, %v419_v41  ;;  %v476_v41 = vsub.s32 0, %v475_v33 }
 0x190   :  { %v455_v38 = vadd.f32 %v454_v23, %v420_v30 }
 0x192   :  { %v456_v46 = vadd.f32 %v455_v38, %v421_v28 }
 0x194   :  { %v457_v48 = vadd.f32 %v456_v46, %v422_v42 }
 0x196   :  { %v458_v49 = vadd.f32 %v457_v48, %v423_v35 }
 0x198   :  { %v459_v59 = vadd.f32 %v458_v49, %v424_v40 }
 0x19a   :  { %v460_v61 = vadd.f32 %v459_v59, %v425_v58 }
 0x19c   :  { %v461_v5 = vadd.f32 %v460_v61, %v426_v60 }
 0x19e   :  { %v462_v7 = vrot.slane %v461_v5, 4 }
 0x1a0   :  { %v463_v9 = vadd.f32 %v462_v7, %v461_v5 }
 0x1a2   :  { %v464_v12 = vrot.slane %v463_v9, 2 }
 0x1a4   :  { %v465_v17 = vadd.f32 %v464_v12, %v463_v9 }
 0x1a6   :  { %v466_v19 = vrot.slane %v465_v17, 1 }
 0x1a8   :  { %v467_v21 = vadd.f32 %v466_v19, %v465_v17 }
 0x1aa   :  { %v468_v24 = vmul.f32 0.0034722222, %v467_v21 }
 0x1ac   :  { %v470_v29 = vadd.f32 1e-05, %v468_v24 }
 0x1ae   :  { %745 = vrsqrt.f32 %v470_v29 }
 0x1b8   :  { %v746_v43 = vpop.eup %745 }
 0x1b9   :  { %v472_v30 = vmul.f32 %v746_v43, %v469_v36 }
 0x1bb   :  { %v477_v23 = vrot.slane %v472_v30, %v476_v41 }
 0x1bd   :  { %v479_v28 = vmul.f32 %v477_v23, %v980_v45  ;;  %v480_v38 = vmul.f32 %v477_v23, %v983_v47  ;;  %v481_v42 = vmul.f32 %v477_v23, %v986_v50  ;;  %v482_v46 = vmul.f32 %v477_v23, %v989_v51 }
 0x1be   :  { %v483_v35 = vmul.f32 %v477_v23, %v992_v52  ;;  %v484_v48 = vmul.f32 %v477_v23, %v995_v53  ;;  %v485_v40 = vmul.f32 %v477_v23, %v998_v54  ;;  %v486_v49 = vmul.f32 %v477_v23, %v1001_v63 }
 0x1bf   :  { %v487_v58 = vmul.f32 %v477_v23, %v1003_v3  ;;  %v488_v59 = vmul.f32 %v477_v23, %v1005_v55  ;;  %v489_v45 = vmul.f32 %v477_v23, %v1008_v62  ;;  %v490_v47 = vmul.f32 %v477_v23, %v1010_v1 }
 0x1c0   :  { %v491_v50 = vmul.f32 %v477_v23, %v1012_v10  ;;  %v492_v51 = vmul.f32 %v477_v23, %v1014_v56  ;;  %v493_v52 = vmul.f32 %v477_v23, %v1016_v15  ;;  %v494_v53 = vmul.f32 %v477_v23, %v1018_v8 }
 0x1c1   :  { %v495_v54 = vmul.f32 %v477_v23, %v1020_v57  ;;  %v496_v63 = vmul.f32 %v477_v23, %v1022_v13  ;;  %v497_v3 = vmul.f32 %v477_v23, %v1024_v22  ;;  %v498_v55 = vmul.f32 %v477_v23, %v1026_v27  ;;  %v642_v22 = vld [vmem:[%s1361_s3] ss:$0 sm:$0xff] }
 0x1c2   :  { %v499_v62 = vmul.f32 %v477_v23, %v1029_v20  ;;  %v500_v1 = vmul.f32 %v477_v23, %v1032_v25  ;;  %v501_v10 = vmul.f32 %v477_v23, %v1035_v34  ;;  %v502_v56 = vmul.f32 %v477_v23, %v1038_v32 }
 0x1c3   :  { %v503_v15 = vmul.f32 %v477_v23, %v1041_v37  ;;  %v504_v8 = vmul.f32 %v477_v23, %v1044_v39  ;;  %v505_v57 = vmul.f32 %v477_v23, %v1047_v44  ;;  %v506_v13 = vmul.f32 %v477_v23, %v1050_v2 }
 0x1c4   :  { %v507_v27 = vmul.f32 %v477_v23, %v1053_v6  ;;  %v508_v20 = vmul.f32 %v477_v23, %v1056_v0  ;;  %v509_v25 = vmul.f32 %v477_v23, %v1059_v4  ;;  %v510_v34 = vmul.f32 %v477_v23, %v1062_v14 }
 0x1c5   :  { %v511_v32 = vmul.f32 %v477_v23, %v1065_v18  ;;  %v512_v37 = vmul.f32 %v477_v23, %v1068_v11  ;;  %v513_v39 = vmul.f32 %v477_v23, %v1071_v16  ;;  %v514_v44 = vmul.f32 %v477_v23, %v1074_v26 }
 0x1c6   :  { %v522_v2 = vadd.f32 %v642_v22, %v479_v28  ;;  %v523_v60 = vadd.f32 %v642_v22, %v480_v38  ;;  %v524_v61 = vadd.f32 %v642_v22, %v481_v42  ;;  %v525_v5 = vadd.f32 %v642_v22, %v482_v46 }
 0x1c7   :  { %v526_v7 = vadd.f32 %v642_v22, %v483_v35  ;;  %v527_v6 = vadd.f32 %v642_v22, %v484_v48  ;;  %v528_v9 = vadd.f32 %v642_v22, %v485_v40  ;;  %v529_v0 = vadd.f32 %v642_v22, %v486_v49 }
 0x1c8   :  { %v530_v12 = vadd.f32 %v642_v22, %v487_v58  ;;  %v531_v4 = vadd.f32 %v642_v22, %v488_v59  ;;  %v532_v17 = vadd.f32 %v642_v22, %v489_v45  ;;  %v533_v14 = vadd.f32 %v642_v22, %v490_v47 }
 0x1c9   :  { %v534_v19 = vadd.f32 %v642_v22, %v491_v50  ;;  %v535_v18 = vadd.f32 %v642_v22, %v492_v51  ;;  %v536_v21 = vadd.f32 %v642_v22, %v493_v52  ;;  %v537_v11 = vadd.f32 %v642_v22, %v494_v53 }
 0x1ca   :  { %v1190_v24 = vadd.f32 %v642_v22, %v495_v54  ;;  %v1192_v16 = vadd.f32 %v642_v22, %v496_v63  ;;  %v1194_v26 = vadd.f32 %v642_v22, %v497_v3  ;;  %v1196_v29 = vadd.f32 %v642_v22, %v498_v55 }
 0x1cb   :  { %v1198_v31 = vadd.f32 %v642_v22, %v499_v62  ;;  %v1200_v33 = vadd.f32 %v642_v22, %v500_v1  ;;  %v1202_v36 = vadd.f32 %v642_v22, %v501_v10  ;;  %v1204_v41 = vadd.f32 %v642_v22, %v502_v56 }
 0x1cc   :  { %v1206_v43 = vadd.f32 %v642_v22, %v503_v15  ;;  %v1208_v30 = vadd.f32 %v642_v22, %v504_v8  ;;  %v1210_v23 = vadd.f32 %v642_v22, %v505_v57  ;;  %v1212_v28 = vadd.f32 %v642_v22, %v506_v13 }
 0x1cd   :  { %v1214_v38 = vadd.f32 %v642_v22, %v507_v27  ;;  %v1216_v42 = vadd.f32 %v642_v22, %v508_v20  ;;  %v1218_v46 = vadd.f32 %v642_v22, %v509_v25  ;;  %v1220_v35 = vadd.f32 %v642_v22, %v510_v34 }
 0x1ce   :  { %v1222_v48 = vadd.f32 %v642_v22, %v511_v32  ;;  %v1224_v40 = vadd.f32 %v642_v22, %v512_v37  ;;  %v1226_v49 = vadd.f32 %v642_v22, %v513_v39  ;;  %v1228_v58 = vadd.f32 %v642_v22, %v514_v44 }
 0x1cf   :  { %v558_v59 = vmax.f32 %v522_v2, 0.0  ;;  %v559_v45 = vmax.f32 %v523_v60, 0.0  ;;  %v560_v47 = vmax.f32 %v524_v61, 0.0  ;;  %v561_v50 = vmax.f32 %v525_v5, 0.0 }
 0x1d0   :  { %v562_v51 = vmax.f32 %v526_v7, 0.0  ;;  %v563_v52 = vmax.f32 %v527_v6, 0.0  ;;  %v564_v53 = vmax.f32 %v528_v9, 0.0  ;;  %v565_v54 = vmax.f32 %v529_v0, 0.0 }
 0x1d1   :  { %v566_v63 = vmax.f32 %v530_v12, 0.0  ;;  %v567_v3 = vmax.f32 %v531_v4, 0.0  ;;  %v568_v55 = vmax.f32 %v532_v17, 0.0  ;;  %v569_v62 = vmax.f32 %v533_v14, 0.0  ;;  %594 = vst [vmem:[%s1362_s4] sm:$0xff] %v558_v59  ;;  %595 = vst [vmem:[%s1362_s4 + $0x8] sm:$0xff] %v559_v45 }
 0x1d2   :  { %596 = vst [vmem:[%s1362_s4 + $0x10] sm:$0xff] %v560_v47  ;;  %597 = vst [vmem:[%s1362_s4 + $0x18] sm:$0xff] %v561_v50  ;;  %v570_v1 = vmax.f32 %v534_v19, 0.0  ;;  %v571_v10 = vmax.f32 %v535_v18, 0.0  ;;  %v572_v56 = vmax.f32 %v536_v21, 0.0  ;;  %v573_v15 = vmax.f32 %v537_v11, 0.0 }
 0x1d3   :  { %598 = vst [vmem:[%s1362_s4 + $0x20] sm:$0xff] %v562_v51  ;;  %599 = vst [vmem:[%s1362_s4 + $0x28] sm:$0xff] %v563_v52  ;;  %v574_v8 = vmax.f32 %v1190_v24, 0.0  ;;  %v575_v57 = vmax.f32 %v1192_v16, 0.0  ;;  %v576_v13 = vmax.f32 %v1194_v26, 0.0  ;;  %v577_v22 = vmax.f32 %v1196_v29, 0.0 }
 0x1d4   :  { %600 = vst [vmem:[%s1362_s4 + $0x30] sm:$0xff] %v564_v53  ;;  %601 = vst [vmem:[%s1362_s4 + $0x38] sm:$0xff] %v565_v54  ;;  %v578_v27 = vmax.f32 %v1198_v31, 0.0  ;;  %v579_v20 = vmax.f32 %v1200_v33, 0.0  ;;  %v580_v25 = vmax.f32 %v1202_v36, 0.0  ;;  %v581_v34 = vmax.f32 %v1204_v41, 0.0 }
 0x1d5   :  { %602 = vst [vmem:[%s1362_s4 + $0x40] sm:$0xff] %v566_v63  ;;  %603 = vst [vmem:[%s1362_s4 + $0x48] sm:$0xff] %v567_v3  ;;  %v582_v32 = vmax.f32 %v1206_v43, 0.0  ;;  %v583_v37 = vmax.f32 %v1208_v30, 0.0  ;;  %v584_v39 = vmax.f32 %v1210_v23, 0.0  ;;  %v585_v44 = vmax.f32 %v1212_v28, 0.0 }
 0x1d6   :  { %604 = vst [vmem:[%s1362_s4 + $0x50] sm:$0xff] %v568_v55  ;;  %605 = vst [vmem:[%s1362_s4 + $0x58] sm:$0xff] %v569_v62  ;;  %v586_v2 = vmax.f32 %v1214_v38, 0.0  ;;  %v587_v60 = vmax.f32 %v1216_v42, 0.0  ;;  %v588_v61 = vmax.f32 %v1218_v46, 0.0  ;;  %v589_v5 = vmax.f32 %v1220_v35, 0.0 }
 0x1d7   :  { %606 = vst [vmem:[%s1362_s4 + $0x60] sm:$0xff] %v570_v1  ;;  %607 = vst [vmem:[%s1362_s4 + $0x68] sm:$0xff] %v571_v10  ;;  %v590_v7 = vmax.f32 %v1222_v48, 0.0  ;;  %v591_v6 = vmax.f32 %v1224_v40, 0.0  ;;  %v592_v9 = vmax.f32 %v1226_v49, 0.0  ;;  %v593_v0 = vmax.f32 %v1228_v58, 0.0 }
 0x1d8   :  { %608 = vst [vmem:[%s1362_s4 + $0x70] sm:$0xff] %v572_v56  ;;  %609 = vst [vmem:[%s1362_s4 + $0x78] sm:$0xff] %v573_v15 }
 0x1d9   :  { %610 = vst [vmem:[%s1362_s4 + $0x80] sm:$0xff] %v574_v8  ;;  %611 = vst [vmem:[%s1362_s4 + $0x88] sm:$0xff] %v575_v57 }
 0x1da   :  { %612 = vst [vmem:[%s1362_s4 + $0x90] sm:$0xff] %v576_v13  ;;  %613 = vst [vmem:[%s1362_s4 + $0x98] sm:$0xff] %v577_v22 }
 0x1db   :  { %614 = vst [vmem:[%s1362_s4 + $0xa0] sm:$0xff] %v578_v27  ;;  %615 = vst [vmem:[%s1362_s4 + $0xa8] sm:$0xff] %v579_v20 }
 0x1dc   :  { %616 = vst [vmem:[%s1362_s4 + $0xb0] sm:$0xff] %v580_v25  ;;  %617 = vst [vmem:[%s1362_s4 + $0xb8] sm:$0xff] %v581_v34 }
 0x1dd   :  { %618 = vst [vmem:[%s1362_s4 + $0xc0] sm:$0xff] %v582_v32  ;;  %619 = vst [vmem:[%s1362_s4 + $0xc8] sm:$0xff] %v583_v37 }
 0x1de   :  { %620 = vst [vmem:[%s1362_s4 + $0xd0] sm:$0xff] %v584_v39  ;;  %621 = vst [vmem:[%s1362_s4 + $0xd8] sm:$0xff] %v585_v44 }
 0x1df   :  { %622 = vst [vmem:[%s1362_s4 + $0xe0] sm:$0xff] %v586_v2  ;;  %623 = vst [vmem:[%s1362_s4 + $0xe8] sm:$0xff] %v587_v60 }
 0x1e0   :  { %624 = vst [vmem:[%s1362_s4 + $0xf0] sm:$0xff] %v588_v61  ;;  %625 = vst [vmem:[%s1362_s4 + $0xf8] sm:$0xff] %v589_v5 }
 0x1e1   :  { %626 = vst [vmem:[%s1362_s4 + $0x100] sm:$0xff] %v590_v7  ;;  %627 = vst [vmem:[%s1362_s4 + $0x108] sm:$0xff] %v591_v6 }
 0x1e2   :  { %628 = vst [vmem:[%s1362_s4 + $0x110] sm:$0xff] %v592_v9  ;;  %629 = vst [vmem:[%s1362_s4 + $0x118] sm:$0xff] %v593_v0 }

// kernel: cnn_forward.4
= control target key start
LH: loop header
LB: loop body
LE: loop exit
PB: predicated region body
PF: predicated region fallthrough
CT: control target
= control target key end

     0   :  { %s882_s1 = inlined_call_operand.vmem [shape: bf16[256,128], index: 1, kind: input, shape index: {}]   ;;  %s883_s0 = inlined_call_operand.vmem [shape: f32[128,256], index: 0, kind: input, shape index: {}]   ;;  %s884_s2 = inlined_call_operand.vmem [shape: f32[1,128], index: 2, kind: input, shape index: {}]   ;;  %s885_s3 = inlined_call_operand.vmem [shape: f32[1,128], index: 3, kind: input, shape index: {}]   ;;  %s886_s4 = inlined_call_operand.vmem [shape: f32[128,128], index: 4, kind: output, shape index: {}]  }
   0x1   :  { %v549_v0 = vld [vmem:[%s882_s1 + $0x40] sm:$0xff]   ;;  %v551_v2 = vld [vmem:[%s882_s1 + $0x48] sm:$0xff]   ;;  %v553_v4 = vld [vmem:[%s882_s1 + $0x50] sm:$0xff]  }
   0x2   :  { %v550_v1 = vld [vmem:[%s882_s1] sm:$0xff]   ;;  %469 = vmatprep.subr.bf16.mxu0 %v549_v0  ;;  %533 = vmatprep.subr.bf16.mxu1 %v549_v0  ;;  %v552_v3 = vld [vmem:[%s882_s1 + $0x8] sm:$0xff]   ;;  %v554_v5 = vld [vmem:[%s882_s1 + $0x10] sm:$0xff]  }
   0x3   :  { %470 = vmatpush3.bf16.msra.mxu0 %v550_v1  ;;  %541 = vmatpush3.bf16.msra.mxu1 %v550_v1  ;;  %v555_v6 = vld [vmem:[%s882_s1 + $0x58] sm:$0xff]   ;;  %v557_v8 = vld [vmem:[%s882_s1 + $0x60] sm:$0xff]   ;;  %v559_v10 = vld [vmem:[%s882_s1 + $0x68] sm:$0xff]  }
   0x4   :  { %471 = vmatprep.subr.bf16.mxu0 %v551_v2  ;;  %534 = vmatprep.subr.bf16.mxu1 %v551_v2  ;;  %v556_v7 = vld [vmem:[%s882_s1 + $0x18] sm:$0xff]   ;;  %v558_v9 = vld [vmem:[%s882_s1 + $0x20] sm:$0xff]   ;;  %v19_v11 = vld [vmem:[%s883_s0 + $0x8] sm:$0xff] }
   0x5   :  { %v21_v12 = vld [vmem:[%s883_s0 + $0x18] sm:$0xff]  ;;  %v35_v14 = vld [vmem:[%s883_s0 + $0x88] sm:$0xff]  ;;  %v561_v17 = vld [vmem:[%s882_s1 + $0x70] sm:$0xff]  }
   0x6   :  { %v51_v13 = vpack.c.bf16 %v21_v12, %v19_v11  ;;  %v560_v15 = vld [vmem:[%s882_s1 + $0x28] sm:$0xff]   ;;  %v37_v16 = vld [vmem:[%s883_s0 + $0x98] sm:$0xff]  ;;  %v562_v19 = vld [vmem:[%s882_s1 + $0x30] sm:$0xff]  }
   0x7   :  { %472 = vmatpush3.bf16.msra.mxu0 %v552_v3  ;;  %542 = vmatpush3.bf16.msra.mxu1 %v552_v3  ;;  %v59_v18 = vpack.c.bf16 %v37_v16, %v35_v14  ;;  %v563_v20 = vld [vmem:[%s882_s1 + $0x78] sm:$0xff]   ;;  %v18_v22 = vld [vmem:[%s883_s0] sm:$0xff]  ;;  %v20_v23 = vld [vmem:[%s883_s0 + $0x10] sm:$0xff] }
   0x8   :  { %473 = vmatprep.subr.bf16.mxu0 %v553_v4  ;;  %535 = vmatprep.subr.bf16.mxu1 %v553_v4  ;;  %v564_v21 = vld [vmem:[%s882_s1 + $0x38] sm:$0xff]   ;;  %v23_v24 = vld [vmem:[%s883_s0 + $0x28] sm:$0xff]  ;;  %v34_v25 = vld [vmem:[%s883_s0 + $0x80] sm:$0xff]  ;;  %v50_v30 = vpack.c.bf16 %v20_v23, %v18_v22 }
   0x9   :  { %226 = vmatprep.mubr.bf16.mxu0 %v51_v13  ;;  %258 = vmatprep.mubr.bf16.mxu1 %v59_v18  ;;  %v36_v26 = vld [vmem:[%s883_s0 + $0x90] sm:$0xff]  ;;  %v25_v27 = vld [vmem:[%s883_s0 + $0x38] sm:$0xff]  ;;  %v39_v28 = vld [vmem:[%s883_s0 + $0xa8] sm:$0xff] }
   0xa   :  { %v41_v29 = vld [vmem:[%s883_s0 + $0xb8] sm:$0xff]  ;;  %v58_v31 = vpack.c.bf16 %v36_v26, %v34_v25  ;;  %v53_v32 = vpack.c.bf16 %v25_v27, %v23_v24  ;;  %v22_v34 = vld [vmem:[%s883_s0 + $0x20] sm:$0xff]  ;;  %v24_v35 = vld [vmem:[%s883_s0 + $0x30] sm:$0xff] }
   0xb   :  { %474 = vmatpush3.bf16.msra.mxu0 %v554_v5  ;;  %543 = vmatpush3.bf16.msra.mxu1 %v554_v5  ;;  %v61_v33 = vpack.c.bf16 %v41_v29, %v39_v28  ;;  %v27_v36 = vld [vmem:[%s883_s0 + $0x48] sm:$0xff]  ;;  %v38_v37 = vld [vmem:[%s883_s0 + $0xa0] sm:$0xff]  ;;  %v40_v38 = vld [vmem:[%s883_s0 + $0xb0] sm:$0xff]  ;;  %v52_v42 = vpack.c.bf16 %v24_v35, %v22_v34 }
   0xc   :  { %475 = vmatprep.subr.bf16.mxu0 %v555_v6  ;;  %536 = vmatprep.subr.bf16.mxu1 %v555_v6  ;;  %v29_v39 = vld [vmem:[%s883_s0 + $0x58] sm:$0xff]  ;;  %v43_v40 = vld [vmem:[%s883_s0 + $0xc8] sm:$0xff]  ;;  %v60_v43 = vpack.c.bf16 %v40_v38, %v38_v37  ;;  %v26_v46 = vld [vmem:[%s883_s0 + $0x40] sm:$0xff] }
   0xd   :  { %v45_v41 = vld [vmem:[%s883_s0 + $0xd8] sm:$0xff]  ;;  %v55_v44 = vpack.c.bf16 %v29_v39, %v27_v36  ;;  %v28_v47 = vld [vmem:[%s883_s0 + $0x50] sm:$0xff]  ;;  %v31_v48 = vld [vmem:[%s883_s0 + $0x68] sm:$0xff] }
   0xe   :  { %v63_v45 = vpack.c.bf16 %v45_v41, %v43_v40  ;;  %v42_v49 = vld [vmem:[%s883_s0 + $0xc0] sm:$0xff]  ;;  %v44_v50 = vld [vmem:[%s883_s0 + $0xd0] sm:$0xff]  ;;  %v33_v51 = vld [vmem:[%s883_s0 + $0x78] sm:$0xff]  ;;  %v54_v54 = vpack.c.bf16 %v28_v47, %v26_v46 }
   0xf   :  { %476 = vmatpush3.bf16.msra.mxu0 %v556_v7  ;;  %544 = vmatpush3.bf16.msra.mxu1 %v556_v7  ;;  %v47_v52 = vld [vmem:[%s883_s0 + $0xe8] sm:$0xff]  ;;  %v49_v53 = vld [vmem:[%s883_s0 + $0xf8] sm:$0xff]  ;;  %v62_v55 = vpack.c.bf16 %v44_v50, %v42_v49  ;;  %v57_v56 = vpack.c.bf16 %v33_v51, %v31_v48  ;;  %v30_v58 = vld [vmem:[%s883_s0 + $0x60] sm:$0xff] }
  0x10   :  { %477 = vmatprep.subr.bf16.mxu0 %v557_v8  ;;  %537 = vmatprep.subr.bf16.mxu1 %v557_v8  ;;  %v65_v57 = vpack.c.bf16 %v49_v53, %v47_v52  ;;  %v32_v59 = vld [vmem:[%s883_s0 + $0x70] sm:$0xff]  ;;  %v46_v60 = vld [vmem:[%s883_s0 + $0xe0] sm:$0xff] }
  0x11   :  { %v48_v61 = vld [vmem:[%s883_s0 + $0xf0] sm:$0xff]  ;;  %v56_v62 = vpack.c.bf16 %v32_v59, %v30_v58 }
  0x12   :  { %v64_v63 = vpack.c.bf16 %v48_v61, %v46_v60 }
  0x13   :  { %478 = vmatpush3.bf16.msra.mxu0 %v558_v9  ;;  %545 = vmatpush3.bf16.msra.mxu1 %v558_v9 }
  0x14   :  { %479 = vmatprep.subr.bf16.mxu0 %v559_v10  ;;  %538 = vmatprep.subr.bf16.mxu1 %v559_v10 }
  0x17   :  { %480 = vmatpush3.bf16.msra.mxu0 %v560_v15  ;;  %546 = vmatpush3.bf16.msra.mxu1 %v560_v15 }
  0x18   :  { %481 = vmatprep.subr.bf16.mxu0 %v561_v17  ;;  %539 = vmatprep.subr.bf16.mxu1 %v561_v17 }
  0x1b   :  { %482 = vmatpush3.bf16.msra.mxu0 %v562_v19  ;;  %547 = vmatpush3.bf16.msra.mxu1 %v562_v19 }
  0x1c   :  { %483 = vmatprep.subr.bf16.mxu0 %v563_v20  ;;  %540 = vmatprep.subr.bf16.mxu1 %v563_v20 }
  0x1f   :  { %484 = vmatpush3.bf16.msra.mxu0 %v564_v21  ;;  %548 = vmatpush3.bf16.msra.mxu1 %v564_v21 }
  0x22   :  { %227 = vmatmul.mubr.bf16.vlgmr.msra.gmra.mrb[0].mxu0 %v50_v30  ;;  %259 = vmatmul.mubr.bf16.vlgmr.msra.gmra.mrb[0].mxu1 %v58_v31 }
  0x23   :  { %234 = vmatprep.mubr.bf16.mxu0 %v53_v32  ;;  %266 = vmatprep.mubr.bf16.mxu1 %v61_v33 }
  0x2a   :  { %235 = vmatmul.mubr.bf16.gmra.mrb[4].mxu0 %v52_v42  ;;  %267 = vmatmul.mubr.bf16.gmra.mrb[4].mxu1 %v60_v43 }
  0x2b   :  { %242 = vmatprep.mubr.bf16.mxu0 %v55_v44  ;;  %274 = vmatprep.mubr.bf16.mxu1 %v63_v45 }
  0x32   :  { %243 = vmatmul.mubr.bf16.gmra.mrb[8].mxu0 %v54_v54  ;;  %275 = vmatmul.mubr.bf16.gmra.mrb[8].mxu1 %v62_v55 }
  0x33   :  { %250 = vmatprep.mubr.bf16.mxu0 %v57_v56  ;;  %282 = vmatprep.mubr.bf16.mxu1 %v65_v57 }
  0x3a   :  { %251 = vmatmul.mubr.bf16.gmra.mrb[12].mxu0 %v56_v62  ;;  %283 = vmatmul.mubr.bf16.gmra.mrb[12].mxu1 %v64_v63 }
  0xf5   :  { %v485_v0 = vpop.f32.mrb[0].mxu0  ;;  %v509_v1 = vpop.f32.mrb[0].mxu1 }
  0xf6   :  { %v486_v2 = vpop.f32.mrb[1].mxu0  ;;  %v510_v3 = vpop.f32.mrb[1].mxu1 }
  0xf7   :  { %v736_v4 = vadd.f32 %v486_v2, %v485_v0  ;;  %v488_v5 = vpop.f32.mrb[2].mxu0  ;;  %v738_v6 = vadd.f32 %v510_v3, %v509_v1  ;;  %v512_v7 = vpop.f32.mrb[2].mxu1 }
  0xf8   :  { %v489_v8 = vpop.f32.mrb[3].mxu0  ;;  %v513_v9 = vpop.f32.mrb[3].mxu1 }
  0xf9   :  { %v490_v10 = vadd.f32 %v489_v8, %v488_v5  ;;  %v740_v11 = vadd.f32 %v513_v9, %v512_v7 }
  0xfb   :  { %v291_v12 = vadd.f32 %v490_v10, %v736_v4 }
  0xfd   :  { %v491_v13 = vpop.f32.mrb[4].mxu0  ;;  %v515_v14 = vpop.f32.mrb[4].mxu1 }
  0xfe   :  { %v492_v15 = vpop.f32.mrb[5].mxu0  ;;  %v516_v16 = vpop.f32.mrb[5].mxu1 }
  0xff   :  { %v493_v17 = vadd.f32 %v492_v15, %v491_v13  ;;  %v494_v18 = vpop.f32.mrb[6].mxu0  ;;  %v517_v19 = vadd.f32 %v516_v16, %v515_v14  ;;  %v518_v20 = vpop.f32.mrb[6].mxu1 }
 0x100   :  { %v495_v21 = vpop.f32.mrb[7].mxu0  ;;  %v519_v22 = vpop.f32.mrb[7].mxu1 }
 0x101   :  { %v292_v23 = vadd.f32 %v493_v17, %v291_v12  ;;  %v496_v24 = vadd.f32 %v495_v21, %v494_v18  ;;  %v520_v25 = vadd.f32 %v519_v22, %v518_v20 }
 0x103   :  { %v293_v26 = vadd.f32 %v496_v24, %v292_v23 }
 0x105   :  { %v497_v27 = vpop.f32.mrb[8].mxu0  ;;  %v521_v28 = vpop.f32.mrb[8].mxu1 }
 0x106   :  { %v498_v29 = vpop.f32.mrb[9].mxu0  ;;  %v522_v30 = vpop.f32.mrb[9].mxu1 }
 0x107   :  { %v499_v31 = vadd.f32 %v498_v29, %v497_v27  ;;  %v500_v32 = vpop.f32.mrb[10].mxu0  ;;  %v523_v33 = vadd.f32 %v522_v30, %v521_v28  ;;  %v524_v34 = vpop.f32.mrb[10].mxu1 }
 0x108   :  { %v501_v35 = vpop.f32.mrb[11].mxu0  ;;  %v525_v36 = vpop.f32.mrb[11].mxu1 }
 0x109   :  { %v294_v37 = vadd.f32 %v499_v31, %v293_v26  ;;  %v502_v38 = vadd.f32 %v501_v35, %v500_v32  ;;  %v526_v39 = vadd.f32 %v525_v36, %v524_v34 }
 0x10b   :  { %v295_v40 = vadd.f32 %v502_v38, %v294_v37 }
 0x10d   :  { %v503_v41 = vpop.f32.mrb[12].mxu0  ;;  %v527_v42 = vpop.f32.mrb[12].mxu1 }
 0x10e   :  { %v504_v43 = vpop.f32.mrb[13].mxu0  ;;  %v528_v44 = vpop.f32.mrb[13].mxu1 }
 0x10f   :  { %v505_v45 = vadd.f32 %v504_v43, %v503_v41  ;;  %v506_v46 = vpop.f32.mrb[14].mxu0  ;;  %v529_v47 = vadd.f32 %v528_v44, %v527_v42  ;;  %v530_v48 = vpop.f32.mrb[14].mxu1 }
 0x110   :  { %v507_v49 = vpop.f32.mrb[15].mxu0  ;;  %v531_v50 = vpop.f32.mrb[15].mxu1 }
 0x111   :  { %v296_v51 = vadd.f32 %v505_v45, %v295_v40  ;;  %v508_v52 = vadd.f32 %v507_v49, %v506_v46  ;;  %v532_v53 = vadd.f32 %v531_v50, %v530_v48 }
 0x113   :  { %v297_v54 = vadd.f32 %v508_v52, %v296_v51 }
 0x115   :  { %v298_v55 = vadd.f32 %v738_v6, %v297_v54 }
 0x117   :  { %v299_v56 = vadd.f32 %v740_v11, %v298_v55 }
 0x119   :  { %v300_v57 = vadd.f32 %v517_v19, %v299_v56 }
 0x11b   :  { %v301_v58 = vadd.f32 %v520_v25, %v300_v57 }
 0x11d   :  { %v302_v59 = vadd.f32 %v523_v33, %v301_v58 }
 0x11f   :  { %v303_v60 = vadd.f32 %v526_v39, %v302_v59 }
 0x121   :  { %v304_v61 = vadd.f32 %v529_v47, %v303_v60 }
 0x123   :  { %v305_v62 = vadd.f32 %v532_v53, %v304_v61  ;;  %v372_v61 = vlaneseq }
 0x125   :  { %v306_v63 = vrot.slane %v305_v62, 4 }
 0x127   :  { %v307_v0 = vadd.f32 %v306_v63, %v305_v62  ;;  %v373_v62 = vshrl.u32 %v372_v61, 7  ;;  %v367_v63 = vld [vmem:[%s884_s2] sm:$0x1] }
 0x129   :  { %v308_v1 = vrot.slane %v307_v0, 2 }
 0x12b   :  { %v309_v2 = vadd.f32 %v308_v1, %v307_v0  ;;  %v374_v0 = vsub.s32 0, %v373_v62 }
 0x12d   :  { %v310_v3 = vrot.slane %v309_v2, 1 }
 0x12f   :  { %v311_v5 = vadd.f32 %v310_v3, %v309_v2 }
 0x131   :  { %v312_v7 = vmul.f32 0.0078125, %v311_v5 }
 0x133   :  { %v746_v8 = vsub.f32 %v736_v4, %v312_v7  ;;  %v748_v9 = vsub.f32 %v490_v10, %v312_v7  ;;  %v750_v12 = vsub.f32 %v493_v17, %v312_v7  ;;  %v752_v13 = vsub.f32 %v496_v24, %v312_v7 }
 0x134   :  { %v754_v14 = vsub.f32 %v499_v31, %v312_v7  ;;  %v756_v15 = vsub.f32 %v502_v38, %v312_v7  ;;  %v758_v16 = vsub.f32 %v505_v45, %v312_v7  ;;  %v760_v18 = vsub.f32 %v508_v52, %v312_v7 }
 0x135   :  { %v763_v20 = vsub.f32 %v738_v6, %v312_v7  ;;  %v766_v4 = vsub.f32 %v740_v11, %v312_v7  ;;  %v768_v10 = vsub.f32 %v517_v19, %v312_v7  ;;  %v770_v17 = vsub.f32 %v520_v25, %v312_v7 }
 0x136   :  { %v772_v21 = vsub.f32 %v523_v33, %v312_v7  ;;  %v774_v22 = vsub.f32 %v526_v39, %v312_v7  ;;  %v776_v23 = vsub.f32 %v529_v47, %v312_v7  ;;  %v778_v24 = vsub.f32 %v532_v53, %v312_v7 }
 0x137   :  { %v329_v26 = vmul.f32 %v746_v8, %v746_v8  ;;  %v330_v6 = vmul.f32 %v748_v9, %v748_v9  ;;  %v331_v11 = vmul.f32 %v750_v12, %v750_v12  ;;  %v332_v25 = vmul.f32 %v752_v13, %v752_v13 }
 0x138   :  { %v333_v28 = vmul.f32 %v754_v14, %v754_v14  ;;  %v334_v30 = vmul.f32 %v756_v15, %v756_v15  ;;  %v335_v32 = vmul.f32 %v758_v16, %v758_v16  ;;  %v336_v34 = vmul.f32 %v760_v18, %v760_v18 }
 0x139   :  { %v345_v19 = vadd.f32 %v330_v6, %v329_v26  ;;  %v337_v36 = vmul.f32 %v763_v20, %v763_v20  ;;  %v338_v38 = vmul.f32 %v766_v4, %v766_v4  ;;  %v339_v40 = vmul.f32 %v768_v10, %v768_v10 }
 0x13a   :  { %v340_v42 = vmul.f32 %v770_v17, %v770_v17  ;;  %v341_v44 = vmul.f32 %v772_v21, %v772_v21  ;;  %v342_v46 = vmul.f32 %v774_v22, %v774_v22  ;;  %v343_v48 = vmul.f32 %v776_v23, %v776_v23 }
 0x13b   :  { %v346_v27 = vadd.f32 %v345_v19, %v331_v11  ;;  %v344_v50 = vmul.f32 %v778_v24, %v778_v24 }
 0x13d   :  { %v347_v29 = vadd.f32 %v346_v27, %v332_v25 }
 0x13f   :  { %v348_v31 = vadd.f32 %v347_v29, %v333_v28  ;;  %v468_v28 = vld [vmem:[%s885_s3] ss:$0 sm:$0xff] }
 0x141   :  { %v349_v33 = vadd.f32 %v348_v31, %v334_v30 }
 0x143   :  { %v350_v35 = vadd.f32 %v349_v33, %v335_v32 }
 0x145   :  { %v351_v37 = vadd.f32 %v350_v35, %v336_v34 }
 0x147   :  { %v352_v39 = vadd.f32 %v351_v37, %v337_v36 }
 0x149   :  { %v353_v41 = vadd.f32 %v352_v39, %v338_v38 }
 0x14b   :  { %v354_v43 = vadd.f32 %v353_v41, %v339_v40 }
 0x14d   :  { %v355_v45 = vadd.f32 %v354_v43, %v340_v42 }
 0x14f   :  { %v356_v47 = vadd.f32 %v355_v45, %v341_v44 }
 0x151   :  { %v357_v49 = vadd.f32 %v356_v47, %v342_v46 }
 0x153   :  { %v358_v51 = vadd.f32 %v357_v49, %v343_v48 }
 0x155   :  { %v359_v52 = vadd.f32 %v358_v51, %v344_v50 }
 0x157   :  { %v360_v53 = vrot.slane %v359_v52, 4 }
 0x159   :  { %v361_v54 = vadd.f32 %v360_v53, %v359_v52 }
 0x15b   :  { %v362_v55 = vrot.slane %v361_v54, 2 }
 0x15d   :  { %v363_v56 = vadd.f32 %v362_v55, %v361_v54 }
 0x15f   :  { %v364_v57 = vrot.slane %v363_v56, 1 }
 0x161   :  { %v365_v58 = vadd.f32 %v364_v57, %v363_v56 }
 0x163   :  { %v366_v59 = vmul.f32 0.0078125, %v365_v58 }
 0x165   :  { %v368_v60 = vadd.f32 1e-05, %v366_v59 }
 0x167   :  { %565 = vrsqrt.f32 %v368_v60 }
 0x171   :  { %v566_v1 = vpop.eup %565 }
 0x172   :  { %v370_v2 = vmul.f32 %v566_v1, %v367_v63 }
 0x174   :  { %v375_v3 = vrot.slane %v370_v2, %v374_v0 }
 0x176   :  { %v377_v5 = vmul.f32 %v375_v3, %v746_v8  ;;  %v378_v7 = vmul.f32 %v375_v3, %v748_v9  ;;  %v379_v26 = vmul.f32 %v375_v3, %v750_v12  ;;  %v380_v6 = vmul.f32 %v375_v3, %v752_v13 }
 0x177   :  { %v381_v11 = vmul.f32 %v375_v3, %v754_v14  ;;  %v382_v19 = vmul.f32 %v375_v3, %v756_v15  ;;  %v383_v25 = vmul.f32 %v375_v3, %v758_v16  ;;  %v384_v27 = vmul.f32 %v375_v3, %v760_v18 }
 0x178   :  { %v385_v8 = vmul.f32 %v375_v3, %v763_v20  ;;  %v386_v9 = vmul.f32 %v375_v3, %v766_v4  ;;  %v387_v12 = vmul.f32 %v375_v3, %v768_v10  ;;  %v388_v13 = vmul.f32 %v375_v3, %v770_v17 }
 0x179   :  { %v389_v14 = vmul.f32 %v375_v3, %v772_v21  ;;  %v390_v15 = vmul.f32 %v375_v3, %v774_v22  ;;  %v391_v16 = vmul.f32 %v375_v3, %v776_v23  ;;  %v392_v18 = vmul.f32 %v375_v3, %v778_v24 }
 0x17a   :  { %v400_v29 = vadd.f32 %v468_v28, %v377_v5  ;;  %v401_v30 = vadd.f32 %v468_v28, %v378_v7  ;;  %v402_v31 = vadd.f32 %v468_v28, %v379_v26  ;;  %v403_v32 = vadd.f32 %v468_v28, %v380_v6 }
 0x17b   :  { %v404_v33 = vadd.f32 %v468_v28, %v381_v11  ;;  %v405_v20 = vadd.f32 %v468_v28, %v382_v19  ;;  %v406_v34 = vadd.f32 %v468_v28, %v383_v25  ;;  %v407_v4 = vadd.f32 %v468_v28, %v384_v27 }
 0x17c   :  { %v408_v35 = vadd.f32 %v468_v28, %v385_v8  ;;  %v409_v10 = vadd.f32 %v468_v28, %v386_v9  ;;  %v410_v36 = vadd.f32 %v468_v28, %v387_v12  ;;  %v411_v17 = vadd.f32 %v468_v28, %v388_v13 }
 0x17d   :  { %v412_v37 = vadd.f32 %v468_v28, %v389_v14  ;;  %v413_v21 = vadd.f32 %v468_v28, %v390_v15  ;;  %v414_v38 = vadd.f32 %v468_v28, %v391_v16  ;;  %v415_v22 = vadd.f32 %v468_v28, %v392_v18 }
 0x17e   :  { %v416_v39 = vmax.f32 %v400_v29, 0.0  ;;  %v417_v23 = vmax.f32 %v401_v30, 0.0  ;;  %v418_v40 = vmax.f32 %v402_v31, 0.0  ;;  %v419_v24 = vmax.f32 %v403_v32, 0.0 }
 0x17f   :  { %v420_v41 = vmax.f32 %v404_v33, 0.0  ;;  %v421_v42 = vmax.f32 %v405_v20, 0.0  ;;  %v422_v43 = vmax.f32 %v406_v34, 0.0  ;;  %v423_v44 = vmax.f32 %v407_v4, 0.0 }
 0x180   :  { %v424_v45 = vmax.f32 %v408_v35, 0.0  ;;  %v425_v46 = vmax.f32 %v409_v10, 0.0  ;;  %v426_v47 = vmax.f32 %v410_v36, 0.0  ;;  %v427_v48 = vmax.f32 %v411_v17, 0.0  ;;  %432 = vst [vmem:[%s886_s4] sm:$0xff] %v416_v39  ;;  %433 = vst [vmem:[%s886_s4 + $0x8] sm:$0xff] %v417_v23 }
 0x181   :  { %434 = vst [vmem:[%s886_s4 + $0x10] sm:$0xff] %v418_v40  ;;  %435 = vst [vmem:[%s886_s4 + $0x18] sm:$0xff] %v419_v24  ;;  %v428_v49 = vmax.f32 %v412_v37, 0.0  ;;  %v429_v50 = vmax.f32 %v413_v21, 0.0  ;;  %v430_v51 = vmax.f32 %v414_v38, 0.0  ;;  %v431_v52 = vmax.f32 %v415_v22, 0.0 }
 0x182   :  { %436 = vst [vmem:[%s886_s4 + $0x20] sm:$0xff] %v420_v41  ;;  %437 = vst [vmem:[%s886_s4 + $0x28] sm:$0xff] %v421_v42 }
 0x183   :  { %438 = vst [vmem:[%s886_s4 + $0x30] sm:$0xff] %v422_v43  ;;  %439 = vst [vmem:[%s886_s4 + $0x38] sm:$0xff] %v423_v44 }
 0x184   :  { %440 = vst [vmem:[%s886_s4 + $0x40] sm:$0xff] %v424_v45  ;;  %441 = vst [vmem:[%s886_s4 + $0x48] sm:$0xff] %v425_v46 }
 0x185   :  { %442 = vst [vmem:[%s886_s4 + $0x50] sm:$0xff] %v426_v47  ;;  %443 = vst [vmem:[%s886_s4 + $0x58] sm:$0xff] %v427_v48 }
 0x186   :  { %444 = vst [vmem:[%s886_s4 + $0x60] sm:$0xff] %v428_v49  ;;  %445 = vst [vmem:[%s886_s4 + $0x68] sm:$0xff] %v429_v50 }
 0x187   :  { %446 = vst [vmem:[%s886_s4 + $0x70] sm:$0xff] %v430_v51  ;;  %447 = vst [vmem:[%s886_s4 + $0x78] sm:$0xff] %v431_v52 }

// kernel: cnn_forward.5
= control target key start
LH: loop header
LB: loop body
LE: loop exit
PB: predicated region body
PF: predicated region fallthrough
CT: control target
= control target key end

     0   :  { %v885_v1 = vmov 0   ;;  %vm888_vm0 = vmmov 0   ;;  %s1152_s2 = inlined_call_operand.vmem [shape: bf16[256,256], index: 2, kind: input, shape index: {}]   ;;  %s1153_s0 = inlined_call_operand.vmem [shape: f32[8,256], index: 0, kind: input, shape index: {}]   ;;  %s1154_s1 = inlined_call_operand.vmem [shape: f32[8,1], index: 1, kind: input, shape index: {}]   ;;  %s1155_s5 = inlined_call_operand.vmem [shape: bf16[256,128], index: 5, kind: input, shape index: {}]   ;;  %s1156_s3 = inlined_call_operand.vmem [shape: f32[1,256], index: 3, kind: input, shape index: {}]   ;;  %s1157_s4 = inlined_call_operand.vmem [shape: f32[1,256], index: 4, kind: input, shape index: {}]   ;;  %s1158_s8 = inlined_call_operand.vmem [shape: bf16[128,128], index: 8, kind: input, shape index: {}]   ;;  %s1159_s6 = inlined_call_operand.vmem [shape: f32[1,128], index: 6, kind: input, shape index: {}]   ;;  %s1160_s7 = inlined_call_operand.vmem [shape: f32[1,128], index: 7, kind: input, shape index: {}]   ;;  %s1161_s9 = inlined_call_operand.vmem [shape: f32[1,128], index: 9, kind: input, shape index: {}]   ;;  %s1162_s10 = inlined_call_operand.vmem [shape: f32[8,128], index: 10, kind: output, shape index: {}]  }
   0x1   :  { %v807_v0 = vld [vmem:[%s1152_s2 + $0x4] ss:$8 sps:$4 sm:$0xff]   ;;  %806 = vset.pattern.permute.xlu0 %v885_v1  ;;  %v809_v2 = vld [vmem:[%s1152_s2] ss:$8 sps:$4 sm:$0xff]   ;;  %v810_v3 = vld [vmem:[%s1152_s2 + $0x14] ss:$8 sps:$4 sm:$0xff]  }
   0x2   :  { %233 = vmatprep.subr.bf16.mxu0 %v807_v0  ;;  %v812_v4 = vld [vmem:[%s1152_s2 + $0x10] ss:$8 sps:$4 sm:$0xff]   ;;  %v813_v5 = vld [vmem:[%s1152_s2 + $0x24] ss:$8 sps:$4 sm:$0xff]   ;;  %v815_v6 = vld [vmem:[%s1152_s2 + $0x20] ss:$8 sps:$4 sm:$0xff]  }
   0x3   :  { %234 = vmatpush1.bf16.msra.mxu0 %v809_v2  ;;  %v816_v7 = vld [vmem:[%s1152_s2 + $0x34] ss:$8 sps:$4 sm:$0xff]   ;;  %v818_v8 = vld [vmem:[%s1152_s2 + $0x30] ss:$8 sps:$4 sm:$0xff]   ;;  %v819_v9 = vld [vmem:[%s1152_s2 + $0x44] ss:$8 sps:$4 sm:$0xff]  }
   0x4   :  { %235 = vmatprep.subr.bf16.mxu0 %v810_v3  ;;  %v821_v10 = vld [vmem:[%s1152_s2 + $0x40] ss:$8 sps:$4 sm:$0xff]   ;;  %v822_v11 = vld [vmem:[%s1152_s2 + $0x54] ss:$8 sps:$4 sm:$0xff]   ;;  %v824_v12 = vld [vmem:[%s1152_s2 + $0x50] ss:$8 sps:$4 sm:$0xff]  }
   0x5   :  { %v825_v13 = vld [vmem:[%s1152_s2 + $0x64] ss:$8 sps:$4 sm:$0xff]   ;;  %v827_v17 = vld [vmem:[%s1152_s2 + $0x60] ss:$8 sps:$4 sm:$0xff]   ;;  %v828_v18 = vld [vmem:[%s1152_s2 + $0x74] ss:$8 sps:$4 sm:$0xff]  }
   0x6   :  { %v38_v14 = vld [vmem:[%s1153_s0 + $0x8] sm:$0xff]  ;;  %v36_v16 = vld [vmem:[%s1154_s1] sm:$0xff]  ;;  %v830_v19 = vld [vmem:[%s1152_s2 + $0x70] ss:$8 sps:$4 sm:$0xff]  }
   0x7   :  { %236 = vmatpush1.bf16.msra.mxu0 %v812_v4  ;;  %v40_v15 = vpack.c.bf16 %v38_v14, %v38_v14  ;;  %278 = vperm.xlu0 %806, %v36_v16   ;;  %v831_v20 = vld [vmem:[%s1152_s2 + $0x84] ss:$8 sps:$4 sm:$0xff]   ;;  %v833_v21 = vld [vmem:[%s1152_s2 + $0x80] ss:$8 sps:$4 sm:$0xff]   ;;  %v834_v22 = vld [vmem:[%s1152_s2 + $0x94] ss:$8 sps:$4 sm:$0xff]  }
   0x8   :  { %237 = vmatprep.subr.bf16.mxu0 %v813_v5  ;;  %v836_v23 = vld [vmem:[%s1152_s2 + $0x90] ss:$8 sps:$4 sm:$0xff]   ;;  %v837_v24 = vld [vmem:[%s1152_s2 + $0xa4] ss:$8 sps:$4 sm:$0xff]   ;;  %v839_v25 = vld [vmem:[%s1152_s2 + $0xa0] ss:$8 sps:$4 sm:$0xff]  }
   0x9   :  { %265 = vmatprep.mubr.bf16.mxu0 %v40_v15  ;;  %v840_v26 = vld [vmem:[%s1152_s2 + $0xb4] ss:$8 sps:$4 sm:$0xff]   ;;  %v842_v27 = vld [vmem:[%s1152_s2 + $0xb0] ss:$8 sps:$4 sm:$0xff]   ;;  %v843_v28 = vld [vmem:[%s1152_s2 + $0xc4] ss:$8 sps:$4 sm:$0xff]  }
   0xa   :  { %v845_v29 = vld [vmem:[%s1152_s2 + $0xc0] ss:$8 sps:$4 sm:$0xff]   ;;  %v846_v30 = vld [vmem:[%s1152_s2 + $0xd4] ss:$8 sps:$4 sm:$0xff]   ;;  %v848_v31 = vld [vmem:[%s1152_s2 + $0xd0] ss:$8 sps:$4 sm:$0xff]  }
   0xb   :  { %238 = vmatpush1.bf16.msra.mxu0 %v815_v6  ;;  %v849_v32 = vld [vmem:[%s1152_s2 + $0xe4] ss:$8 sps:$4 sm:$0xff]   ;;  %v851_v33 = vld [vmem:[%s1152_s2 + $0xe0] ss:$8 sps:$4 sm:$0xff]   ;;  %v852_v34 = vld [vmem:[%s1152_s2 + $0xf4] ss:$8 sps:$4 sm:$0xff]  }
   0xc   :  { %239 = vmatprep.subr.bf16.mxu0 %v816_v7  ;;  %v854_v35 = vld [vmem:[%s1152_s2 + $0xf0] ss:$8 sps:$4 sm:$0xff]   ;;  %v37_v36 = vld [vmem:[%s1153_s0] sm:$0xff]  ;;  %v857_v40 = vld [vmem:[%s1155_s5 + $0x48] sm:$0xff]  }
   0xd   :  { %v39_v37 = vpack.c.bf16 %v37_v36, %v37_v36  ;;  %v855_v38 = vld [vmem:[%s1155_s5 + $0x40] sm:$0xff]   ;;  %v858_v41 = vld [vmem:[%s1155_s5 + $0x8] sm:$0xff]   ;;  %v859_v42 = vld [vmem:[%s1155_s5 + $0x50] sm:$0xff]  }
   0xe   :  { %v856_v39 = vld [vmem:[%s1155_s5] sm:$0xff]   ;;  %751 = vmatprep.subr.bf16.mxu1 %v855_v38  ;;  %v860_v43 = vld [vmem:[%s1155_s5 + $0x10] sm:$0xff]   ;;  %v861_v44 = vld [vmem:[%s1155_s5 + $0x58] sm:$0xff]  }
   0xf   :  { %240 = vmatpush1.bf16.msra.mxu0 %v818_v8  ;;  %752 = vmatpush3.bf16.msra.mxu1 %v856_v39  ;;  %v862_v45 = vld [vmem:[%s1155_s5 + $0x18] sm:$0xff]   ;;  %v863_v46 = vld [vmem:[%s1155_s5 + $0x60] sm:$0xff]   ;;  %v865_v48 = vld [vmem:[%s1155_s5 + $0x68] sm:$0xff]  }
  0x10   :  { %241 = vmatprep.subr.bf16.mxu0 %v819_v9  ;;  %753 = vmatprep.subr.bf16.mxu1 %v857_v40  ;;  %v864_v47 = vld [vmem:[%s1155_s5 + $0x20] sm:$0xff]   ;;  %v866_v49 = vld [vmem:[%s1155_s5 + $0x28] sm:$0xff]   ;;  %v867_v50 = vld [vmem:[%s1155_s5 + $0x70] sm:$0xff]  }
  0x11   :  { %v868_v51 = vld [vmem:[%s1155_s5 + $0x30] sm:$0xff]   ;;  %v869_v52 = vld [vmem:[%s1155_s5 + $0x78] sm:$0xff]  }
  0x12   :  { %v870_v53 = vld [vmem:[%s1155_s5 + $0x38] sm:$0xff]  }
  0x13   :  { %242 = vmatpush1.bf16.msra.mxu0 %v821_v10  ;;  %754 = vmatpush3.bf16.msra.mxu1 %v858_v41 }
  0x14   :  { %243 = vmatprep.subr.bf16.mxu0 %v822_v11  ;;  %755 = vmatprep.subr.bf16.mxu1 %v859_v42 }
  0x17   :  { %244 = vmatpush1.bf16.msra.mxu0 %v824_v12  ;;  %756 = vmatpush3.bf16.msra.mxu1 %v860_v43  ;;  %v274_v43 = vld [vmem:[%s1156_s3] sm:$0x3] }
  0x18   :  { %245 = vmatprep.subr.bf16.mxu0 %v825_v13  ;;  %757 = vmatprep.subr.bf16.mxu1 %v861_v44 }
  0x1b   :  { %246 = vmatpush1.bf16.msra.mxu0 %v827_v17  ;;  %758 = vmatpush3.bf16.msra.mxu1 %v862_v45 }
  0x1c   :  { %247 = vmatprep.subr.bf16.mxu0 %v828_v18  ;;  %759 = vmatprep.subr.bf16.mxu1 %v863_v46 }
  0x1f   :  { %248 = vmatpush1.bf16.msra.mxu0 %v830_v19  ;;  %760 = vmatpush3.bf16.msra.mxu1 %v864_v47  ;;  %v275_v47 = vld [vmem:[%s1157_s4] sm:$0x3] }
  0x20   :  { %249 = vmatprep.subr.bf16.mxu0 %v831_v20  ;;  %761 = vmatprep.subr.bf16.mxu1 %v865_v48 }
  0x23   :  { %250 = vmatpush1.bf16.msra.mxu0 %v833_v21  ;;  %762 = vmatpush3.bf16.msra.mxu1 %v866_v49 }
  0x24   :  { %251 = vmatprep.subr.bf16.mxu0 %v834_v22  ;;  %763 = vmatprep.subr.bf16.mxu1 %v867_v50 }
  0x27   :  { %252 = vmatpush1.bf16.msra.mxu0 %v836_v23  ;;  %764 = vmatpush3.bf16.msra.mxu1 %v868_v51 }
  0x28   :  { %253 = vmatprep.subr.bf16.mxu0 %v837_v24  ;;  %765 = vmatprep.subr.bf16.mxu1 %v869_v52 }
  0x2b   :  { %254 = vmatpush1.bf16.msra.mxu0 %v839_v25  ;;  %766 = vmatpush3.bf16.msra.mxu1 %v870_v53 }
  0x2c   :  { %255 = vmatprep.subr.bf16.mxu0 %v840_v26 }
  0x2f   :  { %256 = vmatpush1.bf16.msra.mxu0 %v842_v27 }
  0x30   :  { %257 = vmatprep.subr.bf16.mxu0 %v843_v28 }
  0x33   :  { %258 = vmatpush1.bf16.msra.mxu0 %v845_v29 }
  0x34   :  { %259 = vmatprep.subr.bf16.mxu0 %v846_v30 }
  0x37   :  { %260 = vmatpush1.bf16.msra.mxu0 %v848_v31 }
  0x38   :  { %261 = vmatprep.subr.bf16.mxu0 %v849_v32 }
  0x3b   :  { %262 = vmatpush1.bf16.msra.mxu0 %v851_v33  ;;  %v886_v33 = vmov 1966171168  }
  0x3c   :  { %263 = vmatprep.subr.bf16.mxu0 %v852_v34  ;;  %v325_v34 = vunpack.c.l.s4 %v886_v33 }
  0x3e   :  { %v326_v36 = vunpack.c.0.s8 %v325_v34 }
  0x3f   :  { %264 = vmatpush1.bf16.msra.mxu0 %v854_v35  ;;  %v327_v35 = vlaneseq }
  0x42   :  { %266 = vmatmul.mubr.bf16.vlgmr.msra.gmra.mrb[0].mxu0 %v39_v37  ;;  %v328_v37 = vshrl.u32 %v327_v35, 7 }
  0x44   :  { %v329_v39 = vsub.s32 %v326_v36, %v328_v37  ;;  %v1106_v45 = vsub.s32 0, %v328_v37  ;;  %v347_v46 = vsub.s32 1, %v328_v37 }
  0x46   :  { %v357_v50 = vrot.slane %v275_v47, %v1106_v45  ;;  %v361_v51 = vrot.slane %v275_v47, %v347_v46 }
  0x86   :  { %v1097_v54 = vpop.permute.xlu0 %278 }
 0x115   :  { %v267_v55 = vpop.f32.mrb[0].mxu0 }
 0x116   :  { %v281_v56 = vmul.f32 %v1097_v54, %v267_v55  ;;  %v269_v57 = vpop.f32.mrb[1].mxu0 }
 0x117   :  { %v282_v58 = vmul.f32 %v1097_v54, %v269_v57  ;;  %v271_v59 = vpop.f32.mrb[2].mxu0 }
 0x118   :  { %v283_v60 = vrot.slane %v281_v56, 4  ;;  %v272_v61 = vpop.f32.mrb[3].mxu0 }
 0x119   :  { %v289_v62 = vrot.slane %v282_v58, 4 }
 0x11a   :  { %v284_v63 = vadd.f32 %v283_v60, %v281_v56 }
 0x11b   :  { %v290_v0 = vadd.f32 %v289_v62, %v282_v58  ;;  %v871_v62 = vld [vmem:[%s1158_s8] sm:$0xff]  }
 0x11c   :  { %v285_v1 = vrot.slane %v284_v63, 2 }
 0x11d   :  { %v291_v2 = vrot.slane %v290_v0, 2 }
 0x11e   :  { %v286_v3 = vadd.f32 %v285_v1, %v284_v63  ;;  %v887_v63 = vmov 0.0   ;;  %v873_v1 = vld [vmem:[%s1158_s8 + $0x10] sm:$0xff]  }
 0x11f   :  { %v292_v4 = vadd.f32 %v291_v2, %v290_v0  ;;  %782 = vmatprep.subr.bf16.mxu1 %v887_v63  ;;  %v872_v0 = vld [vmem:[%s1158_s8 + $0x8] sm:$0xff]   ;;  %v874_v2 = vld [vmem:[%s1158_s8 + $0x18] sm:$0xff]  }
 0x120   :  { %v287_v5 = vrot.slane %v286_v3, 1 }
 0x121   :  { %v293_v6 = vrot.slane %v292_v4, 1 }
 0x122   :  { %v288_v7 = vadd.f32 %v287_v5, %v286_v3  ;;  %v875_v3 = vld [vmem:[%s1158_s8 + $0x20] sm:$0xff]   ;;  %v877_v5 = vld [vmem:[%s1158_s8 + $0x30] sm:$0xff]  }
 0x123   :  { %v294_v8 = vadd.f32 %v293_v6, %v292_v4  ;;  %v876_v4 = vld [vmem:[%s1158_s8 + $0x28] sm:$0xff]   ;;  %v878_v6 = vld [vmem:[%s1158_s8 + $0x38] sm:$0xff]  }
 0x124   :  { %v295_v9 = vmul.f32 0.5, %v288_v7 }
 0x125   :  { %v296_v10 = vmul.f32 0.5, %v294_v8 }
 0x126   :  { %v297_v11 = vsub.f32 %v267_v55, %v295_v9 }
 0x127   :  { %v298_v12 = vsub.f32 %v269_v57, %v296_v10 }
 0x128   :  { %v299_v13 = vmul.f32 %v297_v11, %v1097_v54 }
 0x129   :  { %v300_v14 = vmul.f32 %v298_v12, %v1097_v54 }
 0x12a   :  { %v301_v15 = vmul.f32 %v299_v13, %v299_v13 }
 0x12b   :  { %v302_v16 = vmul.f32 %v300_v14, %v300_v14 }
 0x12c   :  { %v303_v17 = vrot.slane %v301_v15, 4 }
 0x12d   :  { %v309_v18 = vrot.slane %v302_v16, 4 }
 0x12e   :  { %v304_v19 = vadd.f32 %v303_v17, %v301_v15 }
 0x12f   :  { %v310_v20 = vadd.f32 %v309_v18, %v302_v16 }
 0x130   :  { %v305_v21 = vrot.slane %v304_v19, 2 }
 0x131   :  { %v311_v22 = vrot.slane %v310_v20, 2 }
 0x132   :  { %v306_v23 = vadd.f32 %v305_v21, %v304_v19 }
 0x133   :  { %v312_v24 = vadd.f32 %v311_v22, %v310_v20 }
 0x134   :  { %v307_v25 = vrot.slane %v306_v23, 1 }
 0x135   :  { %v313_v26 = vrot.slane %v312_v24, 1 }
 0x136   :  { %v308_v27 = vadd.f32 %v307_v25, %v306_v23 }
 0x137   :  { %v314_v28 = vadd.f32 %v313_v26, %v312_v24 }
 0x138   :  { %v315_v29 = vmul.f32 0.5, %v308_v27 }
 0x139   :  { %v316_v30 = vmul.f32 0.5, %v314_v28 }
 0x13a   :  { %v317_v31 = vadd.f32 1e-05, %v315_v29 }
 0x13b   :  { %v318_v32 = vadd.f32 1e-05, %v316_v30 }
 0x13c   :  { %879 = vrsqrt.f32 %v317_v31  ;;  %v538_v31 = vld [vmem:[%s1159_s6] sm:$0x1] }
 0x13d   :  { %881 = vrsqrt.f32 %v318_v32 }
 0x146   :  { %v880_v38 = vpop.eup %879 }
 0x147   :  { %v882_v40 = vpop.eup %881 }
 0x148   :  { %v323_v41 = vcombine.low %v880_v38, %v882_v40 }
 0x14a   :  { %v330_v42 = vrot.slane %v323_v41, %v329_v39 }
 0x14c   :  { %v337_v44 = vrot.slane %v330_v42, %v329_v39  ;;  %v742_v39 = vld [vmem:[%s1161_s9] ss:$0 sm:$0xff] }
 0x14e   :  { %v339_v48 = vmul.f32 %v337_v44, %v274_v43 }
 0x150   :  { %v348_v49 = vrot.slane %v339_v48, %v347_v46  ;;  %v344_v52 = vrot.slane %v339_v48, %v1106_v45 }
 0x152   :  { %v352_v53 = vmul.f32 %v348_v49, %v298_v12  ;;  %v351_v55 = vmul.f32 %v344_v52, %v297_v11 }
 0x154   :  { %v365_v56 = vadd.f32 %v361_v51, %v352_v53  ;;  %v364_v57 = vadd.f32 %v357_v50, %v351_v55 }
 0x156   :  { %v367_v58 = vmax.f32 %v365_v56, 0.0  ;;  %v366_v59 = vmax.f32 %v364_v57, 0.0 }
 0x158   :  { %v369_v60 = vpack.c.bf16 %v367_v58, %v367_v58  ;;  %v368_v61 = vpack.c.bf16 %v366_v59, %v366_v59 }
 0x15a   :  { %530 = vmatprep.mubr.bf16.mxu1 %v369_v60 }
 0x15b   :  { %531 = vmatmul.mubr.bf16.vlgmr.msra.gmra.mrb[0].mxu1 %v368_v61 }
 0x15c   :  { %783 = vmatpush3.bf16.msra.mxu1 %v871_v62  ;;  %798 = vmatprep.mubr.msk.bf16.mxu1 %vm888_vm0, %v887_v63 }
 0x15d   :  { %784 = vmatprep.subr.bf16.mxu1 %v887_v63 }
 0x160   :  { %785 = vmatpush3.bf16.msra.mxu1 %v872_v0 }
 0x161   :  { %786 = vmatprep.subr.bf16.mxu1 %v887_v63 }
 0x164   :  { %787 = vmatpush3.bf16.msra.mxu1 %v873_v1 }
 0x165   :  { %788 = vmatprep.subr.bf16.mxu1 %v887_v63 }
 0x168   :  { %789 = vmatpush3.bf16.msra.mxu1 %v874_v2 }
 0x169   :  { %790 = vmatprep.subr.bf16.mxu1 %v887_v63 }
 0x16c   :  { %791 = vmatpush3.bf16.msra.mxu1 %v875_v3 }
 0x16d   :  { %792 = vmatprep.subr.bf16.mxu1 %v887_v63 }
 0x170   :  { %793 = vmatpush3.bf16.msra.mxu1 %v876_v4 }
 0x171   :  { %794 = vmatprep.subr.bf16.mxu1 %v887_v63 }
 0x174   :  { %795 = vmatpush3.bf16.msra.mxu1 %v877_v5 }
 0x175   :  { %796 = vmatprep.subr.bf16.mxu1 %v887_v63 }
 0x178   :  { %797 = vmatpush3.bf16.msra.mxu1 %v878_v6 }
 0x22e   :  { %v767_v7 = vpop.f32.mrb[0].mxu1 }
 0x22f   :  { %v768_v8 = vpop.f32.mrb[1].mxu1 }
 0x230   :  { %v769_v9 = vadd.f32 %v768_v8, %v767_v7  ;;  %v770_v10 = vpop.f32.mrb[2].mxu1 }
 0x231   :  { %v771_v11 = vpop.f32.mrb[3].mxu1 }
 0x232   :  { %v540_v12 = vmul.f32 %v769_v9, %v1097_v54 }
 0x234   :  { %v541_v13 = vrot.slane %v540_v12, 4 }
 0x236   :  { %v542_v14 = vadd.f32 %v541_v13, %v540_v12 }
 0x238   :  { %v543_v15 = vrot.slane %v542_v14, 2 }
 0x23a   :  { %v544_v16 = vadd.f32 %v543_v15, %v542_v14 }
 0x23c   :  { %v545_v17 = vrot.slane %v544_v16, 1 }
 0x23e   :  { %v546_v18 = vadd.f32 %v545_v17, %v544_v16 }
 0x240   :  { %v547_v19 = vmul.f32 0.5, %v546_v18 }
 0x242   :  { %v548_v20 = vsub.f32 %v769_v9, %v547_v19 }
 0x244   :  { %v549_v21 = vmul.f32 %v548_v20, %v1097_v54  ;;  %v741_v54 = vld [vmem:[%s1160_s7] ss:$0 sm:$0xff] }
 0x246   :  { %v550_v22 = vmul.f32 %v549_v21, %v549_v21 }
 0x248   :  { %v551_v23 = vrot.slane %v550_v22, 4 }
 0x24a   :  { %v552_v24 = vadd.f32 %v551_v23, %v550_v22 }
 0x24c   :  { %v553_v25 = vrot.slane %v552_v24, 2 }
 0x24e   :  { %v554_v26 = vadd.f32 %v553_v25, %v552_v24 }
 0x250   :  { %v555_v27 = vrot.slane %v554_v26, 1 }
 0x252   :  { %v556_v28 = vadd.f32 %v555_v27, %v554_v26 }
 0x254   :  { %v557_v29 = vmul.f32 0.5, %v556_v28 }
 0x256   :  { %v558_v30 = vadd.f32 1e-05, %v557_v29 }
 0x258   :  { %883 = vrsqrt.f32 %v558_v30 }
 0x262   :  { %v884_v32 = vpop.eup %883 }
 0x263   :  { %v560_v33 = vmul.f32 %v884_v32, %v538_v31 }
 0x265   :  { %v565_v34 = vrot.slane %v560_v33, %v1106_v45 }
 0x267   :  { %v567_v35 = vmul.f32 %v565_v34, %v548_v20 }
 0x269   :  { %v574_v36 = vadd.f32 %v741_v54, %v567_v35 }
 0x26b   :  { %v575_v37 = vmax.f32 %v574_v36, 0.0 }
 0x26d   :  { %v576_v38 = vpack.c.bf16 %v575_v37, %v575_v37 }
 0x26f   :  { %799 = vmatmul.mubr.bf16.vlgmr.msra.gmra.mrb[4].mxu1 %v576_v38 }
 0x342   :  { %v682_v40 = vpop.f32.mrb[4].mxu1 }
 0x343   :  { %v683_v41 = vadd.f32 %v742_v39, %v682_v40  ;;  %v800_v42 = vpop.f32.mrb[5].mxu1 }
 0x344   :  { %v685_v43 = vpop.f32.mrb[6].mxu1 }
 0x345   :  { %688 = vst [vmem:[%s1162_s10] sm:$0xff] %v683_v41  ;;  %v801_v44 = vpop.f32.mrb[7].mxu1 }

</bundles_post_ra>
